<compile_context>
chip_gen: v7x
topology: tpu7x:2x2x1
jax: 0.10.0
libtpu: 0.0.40
codegen_flags: <defaults>
</compile_context>

<pallas_src>
import jax
import jax.numpy as jnp
from jax.experimental import pallas as pl
from jax.experimental.pallas import tpu as pltpu


def _round_up(x: int, m: int) -> int:
    return (x + m - 1) // m * m


def _vmem_limit_bytes() -> int:
    """Per-generation VMEM budget: capacity minus 16 MiB headroom."""
    try:
        cap = int(pltpu.get_tpu_info().vmem_capacity_bytes)
    except Exception:
        cap = 64 << 20          # conservative default (v7x per-core VMEM)
    return max(cap - (16 << 20), 32 << 20)


# ------------------------------- kernel --------------------------------------
def clip_kernel(scale_ref, x_ref, wenc_ref, txt_ref, out_ref, acc_ref):
    # Grid = (batch tiles i, reduction tiles k); k innermost.
    #   scale_ref : SMEM (1, 1) f32           -- logit_scale (pre-exp)
    #   x_ref     : VMEM (TB, TK) f32         -- flattened image tile (cast here)
    #   wenc_ref  : VMEM (TK, Demb_p)         -- encoder weight tile
    #   txt_ref   : VMEM (Demb_p, NC_p)       -- text embeddings, pre-transposed
    #   out_ref   : VMEM (TB, NC_p) f32       -- logits tile
    #   acc_ref   : VMEM (TB, Demb_p) f32     -- image-embedding accumulator
    k = pl.program_id(1)

    @pl.when(k == 0)
    def _init():
        acc_ref[...] = jnp.zeros_like(acc_ref)

    # encode_image (linear projection): accumulate [TB,TK] @ [TK,Demb] in f32.
    # x is cast to the MXU dtype here (VPU cast, hidden under the MXU work).
    acc_ref[...] += jnp.dot(x_ref[...].astype(wenc_ref.dtype), wenc_ref[...],
                            preferred_element_type=jnp.float32)

    @pl.when(k == pl.num_programs(1) - 1)
    def _finalize():
        emb = acc_ref[...]
        # L2 normalize along the last dim (torch .norm(dim=-1, keepdim=True)).
        # eps via maximum(): padded batch rows give 0 instead of NaN; exact for
        # real rows.  rsqrt lowers to the EUP -> effectively free next to MXU.
        sq = jnp.sum(emb * emb, axis=-1, keepdims=True)
        inv = jax.lax.rsqrt(jnp.maximum(sq, 1e-12))
        scale = jnp.exp(scale_ref[0, 0])
        n_cls_p = out_ref.shape[-1]
        d_emb_p = acc_ref.shape[-1]
        if n_cls_p >= d_emb_p:
            # Fold exp(logit_scale) into the (smaller) embedding operand so the
            # MXU result is stored directly.
            emb_n = (emb * (inv * scale)).astype(txt_ref.dtype)
            out_ref[...] = jnp.dot(emb_n, txt_ref[...],
                                   preferred_element_type=jnp.float32)
        else:
            emb_n = (emb * inv).astype(txt_ref.dtype)
            out_ref[...] = scale * jnp.dot(emb_n, txt_ref[...],
                                           preferred_element_type=jnp.float32)


# ----------------------------- host wrappers ----------------------------------
def prepare_clip_params(w_enc, txt_emb, logit_scale, *,
                        compute_dtype=jnp.bfloat16, max_tk=2048, max_tb=512):
    """One-time preparation of the static CLIP parameters.

    Pads + casts W_enc / txt_emb (and pre-transposes txt_emb to [Demb, NC]) so
    the per-call wrapper does no pad/cast HBM traffic on the big operands.
    """
    d_in, d_emb = w_enc.shape
    n_cls, d_emb2 = txt_emb.shape
    assert d_emb2 == d_emb

    d_emb_p = _round_up(d_emb, 128)
    n_cls_p = _round_up(n_cls, 128)
    itemsize = jnp.dtype(compute_dtype).itemsize
    vmem_limit = _vmem_limit_bytes()

    # Reduction tile: as large as possible (fewer grid steps, efficient DMAs),
    # shrunk to fit the explicit VMEM budget (v7x has only 64 MiB).
    def _fits(tk_: int) -> bool:
        need = (max_tb * tk_ * 4 * 2            # x tiles (f32, double-buffered)
                + tk_ * d_emb_p * itemsize * 2  # W tiles (double-buffered)
                + d_emb_p * n_cls_p * itemsize  # txt (resident, single-buffered)
                + max_tb * n_cls_p * 4 * 2      # out tiles (f32, double-buffered)
                + max_tb * d_emb_p * 4)         # f32 accumulator scratch
        return need <= int(vmem_limit * 0.85)

    tk = min(_round_up(d_in, 128), max_tk)
    while tk > 128 and not _fits(tk):
        tk = _round_up(tk // 2, 128)
    d_in_p = _round_up(d_in, tk)

    w_p = jnp.pad(w_enc, ((0, d_in_p - d_in),
                          (0, d_emb_p - d_emb))).astype(compute_dtype)
    # Pad then transpose -> the kernel's second matmul is a plain [TB,Demb] @
    # [Demb,NC] in the MXU's native [K,N] layout (no in-kernel transpose).
    t_p = jnp.pad(txt_emb, ((0, n_cls_p - n_cls),
                            (0, d_emb_p - d_emb))).astype(compute_dtype).T
    scale = jnp.asarray(logit_scale, jnp.float32).reshape(1, 1)

    return dict(w_enc=w_p, txt=t_p, scale=scale,
                d_in=d_in, d_in_p=d_in_p, d_emb_p=d_emb_p,
                n_cls=n_cls, n_cls_p=n_cls_p, tk=tk,
                vmem_limit=int(vmem_limit),
                compute_dtype=jnp.dtype(compute_dtype))


def clip_network_forward(x_nchw, params):
    """x_nchw: [B, C, H, W]; params from prepare_clip_params.
    Returns logits [B, n_cls] in f32."""
    B = x_nchw.shape[0]
    d_in, d_in_p, tk = params["d_in"], params["d_in_p"], params["tk"]
    d_emb_p, n_cls, n_cls_p = params["d_emb_p"], params["n_cls"], params["n_cls_p"]
    cdt = params["compute_dtype"]

    x_flat = x_nchw.reshape(B, -1)
    assert x_flat.shape[1] == d_in

    # Batch tiling: one tile for typical CLIP batches (W_enc streams exactly
    # once); TB=256 for very large batches (256-wide MXU + >=2 parallel tiles).
    b_pad = _round_up(B, 16)            # bf16 sublane packing (fine for f32 too)
    if b_pad <= 512:
        tb = b_pad
    else:
        tb = 256
        b_pad = _round_up(b_pad, tb)

    # Zero-pad x only when unaligned; x stays f32 in HBM and is cast in-kernel.
    x_p = x_flat
    if (b_pad, d_in_p) != x_flat.shape:
        x_p = jnp.pad(x_flat, ((0, b_pad - B), (0, d_in_p - d_in)))

    grid = (b_pad // tb, d_in_p // tk)
    item = cdt.itemsize
    cost = pl.CostEstimate(
        flops=2 * b_pad * d_in_p * d_emb_p + 2 * b_pad * d_emb_p * n_cls_p,
        transcendentals=2 * b_pad,
        bytes_accessed=(b_pad * d_in_p * x_p.dtype.itemsize
                        + d_in_p * d_emb_p * item * grid[0]
                        + n_cls_p * d_emb_p * item
                        + b_pad * n_cls_p * 4 + 4),
    )

    def _run(single_buffer_txt: bool):
        if single_buffer_txt:
            # The txt block never changes (index map is constant) -> no need to
            # double-buffer it; halves the VMEM it holds.
            txt_spec = pl.BlockSpec((d_emb_p, n_cls_p), lambda i, k: (0, 0),
                                    pipeline_mode=pl.Buffered(1))
        else:
            txt_spec = pl.BlockSpec((d_emb_p, n_cls_p), lambda i, k: (0, 0))
        return pl.pallas_call(
            clip_kernel,
            out_shape=jax.ShapeDtypeStruct((b_pad, n_cls_p), jnp.float32),
            grid_spec=pltpu.PrefetchScalarGridSpec(
                num_scalar_prefetch=0,
                grid=grid,
                in_specs=[
                    pl.BlockSpec(memory_space=pltpu.SMEM),             # logit_scale
                    pl.BlockSpec((tb, tk), lambda i, k: (i, k)),       # x tile (f32)
                    pl.BlockSpec((tk, d_emb_p), lambda i, k: (k, 0)),  # W_enc tile
                    txt_spec,                                          # txt (resident)
                ],
                out_specs=pl.BlockSpec((tb, n_cls_p), lambda i, k: (i, 0)),
                scratch_shapes=[pltpu.VMEM((tb, d_emb_p), jnp.float32)],
            ),
            compiler_params=pltpu.CompilerParams(
                dimension_semantics=("parallel", "arbitrary"),
                vmem_limit_bytes=params["vmem_limit"],
            ),
            cost_estimate=cost,
        )(params["scale"], x_p, params["w_enc"], params["txt"])

    try:
        out_p = _run(True)
    except Exception:
        # Fallback for jax versions without BlockSpec pipeline_mode support.
        out_p = _run(False)

    return out_p[:B, :n_cls]


# ------------------------------- references ----------------------------------
def reference_forward(x_nchw, w_enc, txt_emb, logit_scale):
    """Pure-f32 reference (the PyTorch module's math)."""
    B = x_nchw.shape[0]
    x_flat = x_nchw.reshape(B, -1).astype(jnp.float32)
    emb = x_flat @ w_enc
    emb = emb / jnp.linalg.norm(emb, axis=-1, keepdims=True)
    return jnp.exp(logit_scale) * (emb @ txt_emb.T)


def reference_forward_matched(x_nchw, w_enc, txt_emb, logit_scale, dtype):
    """Same math / op order as the kernel's reduced-precision path (dtype MXU
    inputs, f32 accumulation, scale folded into the embedding)."""
    B = x_nchw.shape[0]
    x_flat = x_nchw.reshape(B, -1)
    emb = jnp.dot(x_flat.astype(dtype), w_enc.astype(dtype),
                  preferred_element_type=jnp.float32)
    inv = jax.lax.rsqrt(jnp.maximum(jnp.sum(emb * emb, axis=-1, keepdims=True),
                                    1e-12))
    scale = jnp.exp(jnp.asarray(logit_scale, jnp.float32))
    emb_n = (emb * (inv * scale)).astype(dtype)
    return jnp.dot(emb_n, txt_emb.T.astype(dtype),
                   preferred_element_type=jnp.float32)


if __name__ == "__main__":
    # Small shapes consistent with the module's forward:
    #   x: [B, C, H, W] image batch, txt_emb: [num_classes, embed_dim]
    B, C, H, W = 8, 4, 16, 16          # D_in = 1024
    D_EMB = 128
    N_CLS = 16

    key = jax.random.PRNGKey(0)
    k_x, k_w, k_t = jax.random.split(key, 3)

    x = jax.random.normal(k_x, (B, C, H, W), dtype=jnp.float32)
    w_enc = (jax.random.normal(k_w, (C * H * W, D_EMB), dtype=jnp.float32)
             * (1.0 / jnp.sqrt(C * H * W)))
    txt_emb = jax.random.normal(k_t, (N_CLS, D_EMB), dtype=jnp.float32)
    txt_emb = txt_emb / jnp.linalg.norm(txt_emb, axis=-1, keepdims=True)
    logit_scale = jnp.float32(jnp.log(1.0 / 0.07))  # CLIP default init

    # 1) Exact-semantics check: f32 compute path vs pure-f32 reference.
    params_f32 = prepare_clip_params(w_enc, txt_emb, logit_scale,
                                     compute_dtype=jnp.float32)
    out_f32 = jax.block_until_ready(clip_network_forward(x, params_f32))
    ref_f32 = reference_forward(x, w_enc, txt_emb, logit_scale)
    assert out_f32.shape == (B, N_CLS)
    assert jnp.allclose(out_f32, ref_f32, rtol=2e-4, atol=2e-4), (
        f"f32 path max abs err {jnp.max(jnp.abs(out_f32 - ref_f32))}")

    # 2) Performance path: bf16 MXU inputs, f32 accumulation.
    params_bf16 = prepare_clip_params(w_enc, txt_emb, logit_scale)
    out_bf16 = jax.block_until_ready(clip_network_forward(x, params_bf16))
    ref_bf16 = reference_forward_matched(x, w_enc, txt_emb, logit_scale,
                                         jnp.bfloat16)
    assert out_bf16.shape == (B, N_CLS)
    assert jnp.allclose(out_bf16, ref_bf16, rtol=5e-3, atol=5e-3), (
        f"bf16 path max abs err {jnp.max(jnp.abs(out_bf16 - ref_bf16))}")
    # Sanity check: bf16 path stays close to the full-precision semantics.
    assert jnp.allclose(out_bf16, ref_f32, rtol=5e-2, atol=1e-1), (
        f"bf16-vs-f32 max abs err {jnp.max(jnp.abs(out_bf16 - ref_f32))}")

    print("KERNEL_OK")
</pallas_src>

<mosaic_0001>
module attributes {stable_mosaic.version = 11 : i64} {
  func.func @clip_kernel(%arg0: i32, %arg1: i32, %arg2: memref<1x1xf32, #tpu.memory_space<smem>>, %arg3: memref<16x1024xf32, #tpu.memory_space<vmem>>, %arg4: memref<1024x128xf32, #tpu.memory_space<vmem>>, %arg5: memref<128x128xf32, #tpu.memory_space<vmem>>, %arg6: memref<16x128xf32, #tpu.memory_space<vmem>>, %arg7: memref<16x128xf32, #tpu.memory_space<vmem>>) attributes {dimension_semantics = [#tpu.dimension_semantics<parallel>, #tpu.dimension_semantics<arbitrary>], iteration_bounds = array<i64: 1, 1>, scalar_prefetch = 0 : i64, scratch_operands = 1 : i64, tpu.core_type = #tpu.core_type<tc>, window_params = [{transform_indices = @transform_0, window_bounds = array<i64: 1, 1>}, {transform_indices = @transform_1, window_bounds = array<i64: 16, 1024>}, {transform_indices = @transform_2, window_bounds = array<i64: 1024, 128>}, {pipeline_mode = #tpu.pipeline_mode<synchronous>, transform_indices = @transform_3, window_bounds = array<i64: 128, 128>}, {transform_indices = @transform_4, window_bounds = array<i64: 16, 128>}]} {
    %c0_i32 = arith.constant 0 : i32
    %0 = arith.cmpi eq, %arg1, %c0_i32 : i32
    %1 = arith.extui %0 : i1 to i32
    %c0_i32_0 = arith.constant 0 : i32
    %2 = arith.cmpi ne, %1, %c0_i32_0 : i32
    scf.if %2 {
      %cst_10 = arith.constant 0.000000e+00 : f32
      %12 = vector.broadcast %cst_10 : f32 to vector<16x128xf32>
      %c0_11 = arith.constant 0 : index
      %c0_12 = arith.constant 0 : index
      %13 = vector.load %arg7[%c0_11, %c0_12] : memref<16x128xf32, #tpu.memory_space<vmem>>, vector<16x128xf32>
      tpu.vector_store %arg7[%c0_11, %c0_12], %12 {strides = array<i32>} : memref<16x128xf32, #tpu.memory_space<vmem>>, vector<16x128xf32>,
    } else {
    }
    %c0 = arith.constant 0 : index
    %c0_1 = arith.constant 0 : index
    %3 = vector.load %arg7[%c0, %c0_1] : memref<16x128xf32, #tpu.memory_space<vmem>>, vector<16x128xf32>
    %c0_2 = arith.constant 0 : index
    %c0_3 = arith.constant 0 : index
    %4 = vector.load %arg3[%c0_2, %c0_3] : memref<16x1024xf32, #tpu.memory_space<vmem>>, vector<16x1024xf32>
    %c0_4 = arith.constant 0 : index
    %c0_5 = arith.constant 0 : index
    %5 = vector.load %arg4[%c0_4, %c0_5] : memref<1024x128xf32, #tpu.memory_space<vmem>>, vector<1024x128xf32>
    %cst = arith.constant dense<0.000000e+00> : vector<16x128xf32>
    %6 = tpu.matmul %4, %5, %cst {dimension_numbers = #tpu.dot_dimension_numbers<[1], [0], [0], [1], [0, 0, 1, 1], [], []>} : vector<16x1024xf32>, vector<1024x128xf32>, vector<16x128xf32> -> vector<16x128xf32>
    %7 = arith.addf %3, %6 : vector<16x128xf32>
    %c0_6 = arith.constant 0 : index
    %c0_7 = arith.constant 0 : index
    %8 = vector.load %arg7[%c0_6, %c0_7] : memref<16x128xf32, #tpu.memory_space<vmem>>, vector<16x128xf32>
    tpu.vector_store %arg7[%c0_6, %c0_7], %7 {strides = array<i32>} : memref<16x128xf32, #tpu.memory_space<vmem>>, vector<16x128xf32>,
    %c0_i32_8 = arith.constant 0 : i32
    %9 = arith.cmpi eq, %arg1, %c0_i32_8 : i32
    %10 = arith.extui %9 : i1 to i32
    %c0_i32_9 = arith.constant 0 : i32
    %11 = arith.cmpi ne, %10, %c0_i32_9 : i32
    scf.if %11 {
      %c0_10 = arith.constant 0 : index
      %c0_11 = arith.constant 0 : index
      %12 = vector.load %arg7[%c0_10, %c0_11] : memref<16x128xf32, #tpu.memory_space<vmem>>, vector<16x128xf32>
      %13 = arith.mulf %12, %12 : vector<16x128xf32>
      %cst_12 = arith.constant dense<0.000000e+00> : vector<16xf32>
      %14 = vector.multi_reduction <add>, %13, %cst_12 [1] : vector<16x128xf32> to vector<16xf32>
      %15 = vector.shape_cast %14 : vector<16xf32> to vector<16x1xf32>
      %cst_13 = arith.constant 9.99999996E-13 : f32
      %16 = vector.broadcast %cst_13 : f32 to vector<16x1xf32>
      %17 = arith.maximumf %15, %16 : vector<16x1xf32>
      %18 = math.rsqrt %17 : vector<16x1xf32>
      %c0_14 = arith.constant 0 : index
      %c0_15 = arith.constant 0 : index
      %19 = memref.load %arg2[%c0_14, %c0_15] : memref<1x1xf32, #tpu.memory_space<smem>>
      %20 = math.exp %19 : f32
      %21 = vector.broadcast %20 : f32 to vector<16x1xf32>
      %22 = arith.mulf %18, %21 : vector<16x1xf32>
      %23 = vector.broadcast %22 : vector<16x1xf32> to vector<16x128xf32>
      %24 = arith.mulf %12, %23 : vector<16x128xf32>
      %c0_16 = arith.constant 0 : index
      %c0_17 = arith.constant 0 : index
      %25 = vector.load %arg5[%c0_16, %c0_17] : memref<128x128xf32, #tpu.memory_space<vmem>>, vector<128x128xf32>
      %cst_18 = arith.constant dense<0.000000e+00> : vector<16x128xf32>
      %26 = tpu.matmul %24, %25, %cst_18 {dimension_numbers = #tpu.dot_dimension_numbers<[1], [0], [0], [1], [0, 0, 1, 1], [], []>} : vector<16x128xf32>, vector<128x128xf32>, vector<16x128xf32> -> vector<16x128xf32>
      %c0_19 = arith.constant 0 : index
      %c0_20 = arith.constant 0 : index
      %27 = vector.load %arg6[%c0_19, %c0_20] : memref<16x128xf32, #tpu.memory_space<vmem>>, vector<16x128xf32>
      tpu.vector_store %arg6[%c0_19, %c0_20], %26 {strides = array<i32>} : memref<16x128xf32, #tpu.memory_space<vmem>>, vector<16x128xf32>,
    } else {
    }
    return
  }
  func.func @transform_0(%arg0: i32, %arg1: i32) -> (i32, i32) {
    %c0_i32 = arith.constant 0 : i32
    %c0_i32_0 = arith.constant 0 : i32
    %c0_i32_1 = arith.constant 0 : i32
    return %c0_i32, %c0_i32_0 : i32, i32
  }
  func.func @transform_1(%arg0: i32, %arg1: i32) -> (i32, i32) {
    %c0_i32 = arith.constant 0 : i32
    return %arg0, %arg1 : i32, i32
  }
  func.func @transform_2(%arg0: i32, %arg1: i32) -> (i32, i32) {
    %c0_i32 = arith.constant 0 : i32
    %c0_i32_0 = arith.constant 0 : i32
    return %arg1, %c0_i32 : i32, i32
  }
  func.func @transform_3(%arg0: i32, %arg1: i32) -> (i32, i32) {
    %c0_i32 = arith.constant 0 : i32
    %c0_i32_0 = arith.constant 0 : i32
    %c0_i32_1 = arith.constant 0 : i32
    return %c0_i32, %c0_i32_0 : i32, i32
  }
  func.func @transform_4(%arg0: i32, %arg1: i32) -> (i32, i32) {
    %c0_i32 = arith.constant 0 : i32
    %c0_i32_0 = arith.constant 0 : i32
    return %arg0, %c0_i32 : i32, i32
  }
}

module attributes {stable_mosaic.version = 11 : i64} {
  func.func @clip_kernel(%arg0: i32, %arg1: i32, %arg2: memref<1x1xf32, #tpu.memory_space<smem>>, %arg3: memref<16x1024xf32, #tpu.memory_space<vmem>>, %arg4: memref<1024x128xf32, #tpu.memory_space<vmem>>, %arg5: memref<128x128xf32, #tpu.memory_space<vmem>>, %arg6: memref<16x128xf32, #tpu.memory_space<vmem>>, %arg7: memref<16x128xf32, #tpu.memory_space<vmem>>) attributes {dimension_semantics = [#tpu.dimension_semantics<parallel>, #tpu.dimension_semantics<arbitrary>], iteration_bounds = array<i64: 1, 1>, scalar_prefetch = 0 : i64, scratch_operands = 1 : i64, tpu.core_type = #tpu.core_type<tc>, window_params = [{transform_indices = @transform_0, window_bounds = array<i64: 1, 1>}, {transform_indices = @transform_1, window_bounds = array<i64: 16, 1024>}, {transform_indices = @transform_2, window_bounds = array<i64: 1024, 128>}, {pipeline_mode = #tpu.pipeline_mode<synchronous>, transform_indices = @transform_3, window_bounds = array<i64: 128, 128>}, {transform_indices = @transform_4, window_bounds = array<i64: 16, 128>}]} {
    %c0_i32 = arith.constant 0 : i32
    %0 = arith.cmpi eq, %arg1, %c0_i32 : i32
    %1 = arith.extui %0 : i1 to i32
    %c0_i32_0 = arith.constant 0 : i32
    %2 = arith.cmpi ne, %1, %c0_i32_0 : i32
    scf.if %2 {
      %cst_10 = arith.constant 0.000000e+00 : f32
      %12 = vector.broadcast %cst_10 : f32 to vector<16x128xf32>
      %c0_11 = arith.constant 0 : index
      %c0_12 = arith.constant 0 : index
      %13 = vector.load %arg7[%c0_11, %c0_12] : memref<16x128xf32, #tpu.memory_space<vmem>>, vector<16x128xf32>
      tpu.vector_store %arg7[%c0_11, %c0_12], %12 {strides = array<i32>} : memref<16x128xf32, #tpu.memory_space<vmem>>, vector<16x128xf32>,
    } else {
    }
    %c0 = arith.constant 0 : index
    %c0_1 = arith.constant 0 : index
    %3 = vector.load %arg7[%c0, %c0_1] : memref<16x128xf32, #tpu.memory_space<vmem>>, vector<16x128xf32>
    %c0_2 = arith.constant 0 : index
    %c0_3 = arith.constant 0 : index
    %4 = vector.load %arg3[%c0_2, %c0_3] : memref<16x1024xf32, #tpu.memory_space<vmem>>, vector<16x1024xf32>
    %c0_4 = arith.constant 0 : index
    %c0_5 = arith.constant 0 : index
    %5 = vector.load %arg4[%c0_4, %c0_5] : memref<1024x128xf32, #tpu.memory_space<vmem>>, vector<1024x128xf32>
    %cst = arith.constant dense<0.000000e+00> : vector<16x128xf32>
    %6 = tpu.matmul %4, %5, %cst {dimension_numbers = #tpu.dot_dimension_numbers<[1], [0], [0], [1], [0, 0, 1, 1], [], []>} : vector<16x1024xf32>, vector<1024x128xf32>, vector<16x128xf32> -> vector<16x128xf32>
    %7 = arith.addf %3, %6 : vector<16x128xf32>
    %c0_6 = arith.constant 0 : index
    %c0_7 = arith.constant 0 : index
    %8 = vector.load %arg7[%c0_6, %c0_7] : memref<16x128xf32, #tpu.memory_space<vmem>>, vector<16x128xf32>
    tpu.vector_store %arg7[%c0_6, %c0_7], %7 {strides = array<i32>} : memref<16x128xf32, #tpu.memory_space<vmem>>, vector<16x128xf32>,
    %c0_i32_8 = arith.constant 0 : i32
    %9 = arith.cmpi eq, %arg1, %c0_i32_8 : i32
    %10 = arith.extui %9 : i1 to i32
    %c0_i32_9 = arith.constant 0 : i32
    %11 = arith.cmpi ne, %10, %c0_i32_9 : i32
    scf.if %11 {
      %c0_10 = arith.constant 0 : index
      %c0_11 = arith.constant 0 : index
      %12 = vector.load %arg7[%c0_10, %c0_11] : memref<16x128xf32, #tpu.memory_space<vmem>>, vector<16x128xf32>
      %13 = arith.mulf %12, %12 : vector<16x128xf32>
      %cst_12 = arith.constant dense<0.000000e+00> : vector<16xf32>
      %14 = vector.multi_reduction <add>, %13, %cst_12 [1] : vector<16x128xf32> to vector<16xf32>
      %15 = vector.shape_cast %14 : vector<16xf32> to vector<16x1xf32>
      %cst_13 = arith.constant 9.99999996E-13 : f32
      %16 = vector.broadcast %cst_13 : f32 to vector<16x1xf32>
      %17 = arith.maximumf %15, %16 : vector<16x1xf32>
      %18 = math.rsqrt %17 : vector<16x1xf32>
      %c0_14 = arith.constant 0 : index
      %c0_15 = arith.constant 0 : index
      %19 = memref.load %arg2[%c0_14, %c0_15] : memref<1x1xf32, #tpu.memory_space<smem>>
      %20 = math.exp %19 : f32
      %21 = vector.broadcast %20 : f32 to vector<16x1xf32>
      %22 = arith.mulf %18, %21 : vector<16x1xf32>
      %23 = vector.broadcast %22 : vector<16x1xf32> to vector<16x128xf32>
      %24 = arith.mulf %12, %23 : vector<16x128xf32>
      %c0_16 = arith.constant 0 : index
      %c0_17 = arith.constant 0 : index
      %25 = vector.load %arg5[%c0_16, %c0_17] : memref<128x128xf32, #tpu.memory_space<vmem>>, vector<128x128xf32>
      %cst_18 = arith.constant dense<0.000000e+00> : vector<16x128xf32>
      %26 = tpu.matmul %24, %25, %cst_18 {dimension_numbers = #tpu.dot_dimension_numbers<[1], [0], [0], [1], [0, 0, 1, 1], [], []>} : vector<16x128xf32>, vector<128x128xf32>, vector<16x128xf32> -> vector<16x128xf32>
      %c0_19 = arith.constant 0 : index
      %c0_20 = arith.constant 0 : index
      %27 = vector.load %arg6[%c0_19, %c0_20] : memref<16x128xf32, #tpu.memory_space<vmem>>, vector<16x128xf32>
      tpu.vector_store %arg6[%c0_19, %c0_20], %26 {strides = array<i32>} : memref<16x128xf32, #tpu.memory_space<vmem>>, vector<16x128xf32>,
    } else {
    }
    return
  }
  func.func @transform_0(%arg0: i32, %arg1: i32) -> (i32, i32) {
    %c0_i32 = arith.constant 0 : i32
    %c0_i32_0 = arith.constant 0 : i32
    %c0_i32_1 = arith.constant 0 : i32
    return %c0_i32, %c0_i32_0 : i32, i32
  }
  func.func @transform_1(%arg0: i32, %arg1: i32) -> (i32, i32) {
    %c0_i32 = arith.constant 0 : i32
    return %arg0, %arg1 : i32, i32
  }
  func.func @transform_2(%arg0: i32, %arg1: i32) -> (i32, i32) {
    %c0_i32 = arith.constant 0 : i32
    %c0_i32_0 = arith.constant 0 : i32
    return %arg1, %c0_i32 : i32, i32
  }
  func.func @transform_3(%arg0: i32, %arg1: i32) -> (i32, i32) {
    %c0_i32 = arith.constant 0 : i32
    %c0_i32_0 = arith.constant 0 : i32
    %c0_i32_1 = arith.constant 0 : i32
    return %c0_i32, %c0_i32_0 : i32, i32
  }
  func.func @transform_4(%arg0: i32, %arg1: i32) -> (i32, i32) {
    %c0_i32 = arith.constant 0 : i32
    %c0_i32_0 = arith.constant 0 : i32
    return %arg0, %c0_i32 : i32, i32
  }
}

</mosaic_0001>

<bundles_post_ra>
// kernel: tpu_custom_call.1
= control target key start
LH: loop header
LB: loop body
LE: loop exit
PB: predicated region body
PF: predicated region fallthrough
CT: control target
= control target key end

     0   :  { %10 = vsyncpa [#allocation5], 0  ;;  %s1220_s0 = inlined_call_operand.<no memory space> [shape: f32[1,1], index: 0, kind: input, shape index: {}]   ;;  %s1221_s1 = inlined_call_operand.hbm [shape: f32[16,1024], index: 1, kind: input, shape index: {}]   ;;  %s1222_s2 = inlined_call_operand.hbm [shape: f32[1024,128], index: 2, kind: input, shape index: {}]   ;;  %s1223_s3 = inlined_call_operand.hbm [shape: f32[128,128], index: 3, kind: input, shape index: {}]   ;;  %s1224_s4 = inlined_call_operand.hbm [shape: f32[16,128], index: 4, kind: output, shape index: {}]  }
   0x1   :  { %11 = vsyncpa [#allocation8], 0 }
   0x2   :  { %12 = vsyncpa [#allocation6], 0  ;;  %s1127_s15 = smov [#allocation7]   ;;  %s1033_s19 = scalar_lea.hbm %s1222_s2, 16384 }
   0x3   :  { %s32_s16 = sshll.u32 %s1127_s15, 4  ;;  %p1034_p0 = scmp.ne.s32.totalorder %s1222_s2, %s1033_s19  ;;  %s33_s16 = int_to_ptr.vmem [resolvable:$true] %s32_s16 }
   0x4   :  { %p1037_p1 = scmp.lt.u32.totalorder %s1033_s19, %s1222_s2 }
   0x6   :  { %p1039_p2 = pnand %p1037_p1, %p1034_p0 }
   0x8   :  { %1042 = shalt.err (!%p1039_p2)
}
   0x9   :  { %s1043_s24 = scalar_lea.vmem %s33_s16, 16384  ;;  %p1048_p4 = scmp.lt.s32.totalorder %s33_s16, %s33_s16 }
   0xa   :  { %p1044_p3 = scmp.ne.s32.totalorder %s33_s16, %s1043_s24  ;;  %p1049_p5 = scmp.lt.s32.totalorder %s1043_s24, %s1043_s24 }
   0xc   :  { %p1050_p6 = por %p1049_p5, %p1048_p4 }
   0xe   :  { %p1051_p7 = pnand %p1050_p6, %p1044_p3 }
  0x10   :  { %1054 = shalt.err (!%p1051_p7)
}
  0x11   :  { %s1128_s25 = smov 128   ;;  %s1129_s26 = smov 8  }
  0x12   :  { %38 = dma.hbm_to_vmem [thread:$0]  %s1222_s2, 16384, %s33_s16, [#allocation8], %s1128_s25, %s1128_s25, %s1129_s26  }
  0x13   :  { %s1130_s29 = smov [#allocation4]   ;;  %s1055_s7 = scalar_lea.hbm %s1221_s1, 2048 }
  0x14   :  { %s20_s30 = sshll.u32 %s1130_s29, 4  ;;  %p1056_p8 = scmp.ne.s32.totalorder %s1221_s1, %s1055_s7  ;;  %s21_s30 = int_to_ptr.vmem [resolvable:$true] %s20_s30 }
  0x15   :  { %p1059_p9 = scmp.lt.u32.totalorder %s1055_s7, %s1221_s1 }
  0x17   :  { %p1061_p10 = pnand %p1059_p9, %p1056_p8 }
  0x19   :  { %1064 = shalt.err (!%p1061_p10)
}
  0x1a   :  { %s1065_s12 = scalar_lea.vmem %s21_s30, 2048  ;;  %p1070_p12 = scmp.lt.s32.totalorder %s21_s30, %s21_s30 }
  0x1b   :  { %p1066_p11 = scmp.ne.s32.totalorder %s21_s30, %s1065_s12  ;;  %p1071_p13 = scmp.lt.s32.totalorder %s1065_s12, %s1065_s12 }
  0x1d   :  { %p1072_p0 = por %p1071_p13, %p1070_p12 }
  0x1f   :  { %p1073_p1 = pnand %p1072_p0, %p1066_p11 }
  0x21   :  { %1076 = shalt.err (!%p1073_p1)
}
  0x22   :  { %s1131_s2 = smov 1024   ;;  %s1132_s13 = smov 64  }
  0x23   :  { %26 = dma.hbm_to_vmem [thread:$0]  %s1221_s1, 2048, %s21_s30, [#allocation5], %s1131_s2, %s1131_s2, %s1132_s13  }
  0x24   :  { %s1133_s16 = smov [#allocation9]   ;;  %s1077_s20 = scalar_lea.hbm %s1223_s3, 2048 }
  0x25   :  { %s44_s17 = sshll.u32 %s1133_s16, 4  ;;  %p1078_p2 = scmp.ne.s32.totalorder %s1223_s3, %s1077_s20  ;;  %s45_s17 = int_to_ptr.vmem [resolvable:$true] %s44_s17 }
  0x26   :  { %p1081_p3 = scmp.lt.u32.totalorder %s1077_s20, %s1223_s3 }
  0x28   :  { %p1083_p4 = pnand %p1081_p3, %p1078_p2 }
  0x2a   :  { %1086 = shalt.err (!%p1083_p4)
}
  0x2b   :  { %s1087_s27 = scalar_lea.vmem %s45_s17, 2048  ;;  %p1092_p6 = scmp.lt.s32.totalorder %s45_s17, %s45_s17 }
  0x2c   :  { %p1088_p5 = scmp.ne.s32.totalorder %s45_s17, %s1087_s27  ;;  %p1093_p7 = scmp.lt.s32.totalorder %s1087_s27, %s1087_s27 }
  0x2e   :  { %p1094_p8 = por %p1093_p7, %p1092_p6 }
  0x30   :  { %p1095_p9 = pnand %p1094_p8, %p1088_p5 }
  0x32   :  { %1098 = shalt.err (!%p1095_p9)
}
  0x33   :  { %50 = dma.hbm_to_vmem [thread:$0]  %s1223_s3, 2048, %s45_s17, [#allocation8], %s1128_s25, %s1128_s25, %s1129_s26  }
  0x34   :  { %1121 = dma.done.wait [#allocation5], 2048  }
  0x35   :  { %1122 = vsyncadd [#allocation5], 4294965248 }
  0x36   :  { %1123 = dma.done.wait [#allocation8], 18432  }
  0x37   :  { %1124 = vsyncadd [#allocation8], 4294948864  ;;  %v100_v0 = vld [vmem:[#allocation7 + $0x80] sm:$0xff]  ;;  %v101_v1 = vld [vmem:[#allocation7 + $0x88] sm:$0xff]  ;;  %s1134_s30 = smov [#allocation10]  }
  0x38   :  { %v132_v2 = vld [vmem:[#allocation7 + $0x180] sm:$0xff]  ;;  %v857_v3 = vpack.c.bf16 %v101_v1, %v100_v0  ;;  %v133_v4 = vld [vmem:[#allocation7 + $0x188] sm:$0xff]  ;;  %v102_v11 = vld [vmem:[#allocation7 + $0x90] sm:$0xff]  ;;  %s639_s5 = sshll.u32 %s1134_s30, 4  ;;  %s640_s5 = int_to_ptr.vmem [resolvable:$true] %s639_s5 }
  0x39   :  { %v84_v5 = vld [vmem:[#allocation7] sm:$0xff]  ;;  %v85_v6 = vld [vmem:[#allocation7 + $0x8] sm:$0xff]  ;;  %v889_v7 = vpack.c.bf16 %v133_v4, %v132_v2  ;;  %v103_v13 = vld [vmem:[#allocation7 + $0x98] sm:$0xff]  ;;  %s1099_s6 = scalar_lea.vmem %s640_s5, 256  ;;  %p1104_p11 = scmp.lt.s32.totalorder %s640_s5, %s640_s5 }
  0x3a   :  { %v859_v8 = vpack.c.bf16 %v85_v6, %v84_v5  ;;  %v116_v9 = vld [vmem:[#allocation7 + $0x100] sm:$0xff]  ;;  %v117_v10 = vld [vmem:[#allocation7 + $0x108] sm:$0xff]  ;;  %858 = vmatprep.subr.bf16.mxu0 %v857_v3  ;;  %v134_v14 = vld [vmem:[#allocation7 + $0x190] sm:$0xff]  ;;  %v861_v16 = vpack.c.bf16 %v103_v13, %v102_v11  ;;  %p1100_p10 = scmp.ne.s32.totalorder %s640_s5, %s1099_s6  ;;  %p1105_p12 = scmp.lt.s32.totalorder %s1099_s6, %s1099_s6 }
  0x3b   :  { %v891_v12 = vpack.c.bf16 %v117_v10, %v116_v9  ;;  %v135_v15 = vld [vmem:[#allocation7 + $0x198] sm:$0xff]  ;;  %890 = vmatprep.subr.bf16.mxu1 %v889_v7  ;;  %v86_v18 = vld [vmem:[#allocation7 + $0x10] sm:$0xff]  ;;  %v104_v23 = vld [vmem:[#allocation7 + $0xa0] sm:$0xff] }
  0x3c   :  { %860 = vmatpush3.bf16.msra.mxu0 %v859_v8  ;;  %v893_v17 = vpack.c.bf16 %v135_v15, %v134_v14  ;;  %v87_v19 = vld [vmem:[#allocation7 + $0x18] sm:$0xff]  ;;  %v118_v20 = vld [vmem:[#allocation7 + $0x110] sm:$0xff]  ;;  %v105_v24 = vld [vmem:[#allocation7 + $0xa8] sm:$0xff]  ;;  %p1106_p13 = por %p1105_p12, %p1104_p11 }
  0x3d   :  { %892 = vmatpush3.bf16.msra.mxu1 %v891_v12  ;;  %v863_v21 = vpack.c.bf16 %v87_v19, %v86_v18  ;;  %v119_v22 = vld [vmem:[#allocation7 + $0x118] sm:$0xff]  ;;  %862 = vmatprep.subr.bf16.mxu0 %v861_v16  ;;  %v865_v26 = vpack.c.bf16 %v105_v24, %v104_v23  ;;  %v136_v27 = vld [vmem:[#allocation7 + $0x1a0] sm:$0xff]  ;;  %v137_v28 = vld [vmem:[#allocation7 + $0x1a8] sm:$0xff] }
  0x3e   :  { %894 = vmatprep.subr.bf16.mxu1 %v893_v17  ;;  %v895_v25 = vpack.c.bf16 %v119_v22, %v118_v20  ;;  %v88_v29 = vld [vmem:[#allocation7 + $0x20] sm:$0xff]  ;;  %v897_v30 = vpack.c.bf16 %v137_v28, %v136_v27  ;;  %v89_v31 = vld [vmem:[#allocation7 + $0x28] sm:$0xff]  ;;  %v106_v35 = vld [vmem:[#allocation7 + $0xb0] sm:$0xff]  ;;  %p1107_p0 = pnand %p1106_p13, %p1100_p10 }
  0x3f   :  { %v120_v32 = vld [vmem:[#allocation7 + $0x120] sm:$0xff]  ;;  %v121_v33 = vld [vmem:[#allocation7 + $0x128] sm:$0xff]  ;;  %v867_v34 = vpack.c.bf16 %v89_v31, %v88_v29  ;;  %v107_v36 = vld [vmem:[#allocation7 + $0xb8] sm:$0xff] }
  0x40   :  { %864 = vmatpush3.bf16.msra.mxu0 %v863_v21  ;;  %v138_v37 = vld [vmem:[#allocation7 + $0x1b0] sm:$0xff]  ;;  %v899_v38 = vpack.c.bf16 %v121_v33, %v120_v32  ;;  %v869_v39 = vpack.c.bf16 %v107_v36, %v106_v35  ;;  %v139_v40 = vld [vmem:[#allocation7 + $0x1b8] sm:$0xff]  ;;  %v108_v46 = vld [vmem:[#allocation7 + $0xc0] sm:$0xff] }
  0x41   :  { %896 = vmatpush3.bf16.msra.mxu1 %v895_v25  ;;  %866 = vmatprep.subr.bf16.mxu0 %v865_v26  ;;  %v90_v41 = vld [vmem:[#allocation7 + $0x30] sm:$0xff]  ;;  %v91_v42 = vld [vmem:[#allocation7 + $0x38] sm:$0xff]  ;;  %v901_v43 = vpack.c.bf16 %v139_v40, %v138_v37  ;;  %v109_v47 = vld [vmem:[#allocation7 + $0xc8] sm:$0xff] }
  0x42   :  { %898 = vmatprep.subr.bf16.mxu1 %v897_v30  ;;  %v122_v44 = vld [vmem:[#allocation7 + $0x130] sm:$0xff]  ;;  %v123_v45 = vld [vmem:[#allocation7 + $0x138] sm:$0xff]  ;;  %v140_v48 = vld [vmem:[#allocation7 + $0x1c0] sm:$0xff]  ;;  %v871_v50 = vpack.c.bf16 %v91_v42, %v90_v41  ;;  %v873_v52 = vpack.c.bf16 %v109_v47, %v108_v46 }
  0x43   :  { %v141_v49 = vld [vmem:[#allocation7 + $0x1c8] sm:$0xff]  ;;  %v903_v51 = vpack.c.bf16 %v123_v45, %v122_v44  ;;  %v92_v53 = vld [vmem:[#allocation7 + $0x40] sm:$0xff]  ;;  %v110_v58 = vld [vmem:[#allocation7 + $0xd0] sm:$0xff] }
  0x44   :  { %868 = vmatpush3.bf16.msra.mxu0 %v867_v34  ;;  %v93_v54 = vld [vmem:[#allocation7 + $0x48] sm:$0xff]  ;;  %v124_v55 = vld [vmem:[#allocation7 + $0x140] sm:$0xff]  ;;  %v905_v56 = vpack.c.bf16 %v141_v49, %v140_v48  ;;  %v111_v59 = vld [vmem:[#allocation7 + $0xd8] sm:$0xff] }
  0x45   :  { %900 = vmatpush3.bf16.msra.mxu1 %v899_v38  ;;  %870 = vmatprep.subr.bf16.mxu0 %v869_v39  ;;  %v125_v57 = vld [vmem:[#allocation7 + $0x148] sm:$0xff]  ;;  %v142_v60 = vld [vmem:[#allocation7 + $0x1d0] sm:$0xff]  ;;  %v143_v61 = vld [vmem:[#allocation7 + $0x1d8] sm:$0xff]  ;;  %v875_v62 = vpack.c.bf16 %v93_v54, %v92_v53  ;;  %v877_v0 = vpack.c.bf16 %v111_v59, %v110_v58 }
  0x46   :  { %902 = vmatprep.subr.bf16.mxu1 %v901_v43  ;;  %v907_v63 = vpack.c.bf16 %v125_v57, %v124_v55  ;;  %v94_v1 = vld [vmem:[#allocation7 + $0x50] sm:$0xff]  ;;  %v95_v2 = vld [vmem:[#allocation7 + $0x58] sm:$0xff]  ;;  %v909_v4 = vpack.c.bf16 %v143_v61, %v142_v60  ;;  %v112_v6 = vld [vmem:[#allocation7 + $0xe0] sm:$0xff] }
  0x47   :  { %v126_v3 = vld [vmem:[#allocation7 + $0x150] sm:$0xff]  ;;  %v127_v5 = vld [vmem:[#allocation7 + $0x158] sm:$0xff]  ;;  %v113_v7 = vld [vmem:[#allocation7 + $0xe8] sm:$0xff]  ;;  %v879_v10 = vpack.c.bf16 %v95_v2, %v94_v1 }
  0x48   :  { %872 = vmatpush3.bf16.msra.mxu0 %v871_v50  ;;  %v144_v8 = vld [vmem:[#allocation7 + $0x1e0] sm:$0xff]  ;;  %v145_v9 = vld [vmem:[#allocation7 + $0x1e8] sm:$0xff]  ;;  %v911_v13 = vpack.c.bf16 %v127_v5, %v126_v3  ;;  %v881_v14 = vpack.c.bf16 %v113_v7, %v112_v6  ;;  %v71_v17 = vld [vmem:[#allocation4 + $0x18] sm:$0xff] }
  0x49   :  { %904 = vmatpush3.bf16.msra.mxu1 %v903_v51  ;;  %874 = vmatprep.subr.bf16.mxu0 %v873_v52  ;;  %v96_v11 = vld [vmem:[#allocation7 + $0x60] sm:$0xff]  ;;  %v97_v12 = vld [vmem:[#allocation7 + $0x68] sm:$0xff]  ;;  %v913_v18 = vpack.c.bf16 %v145_v9, %v144_v8  ;;  %v114_v20 = vld [vmem:[#allocation7 + $0xf0] sm:$0xff] }
  0x4a   :  { %906 = vmatprep.subr.bf16.mxu1 %v905_v56  ;;  %v128_v15 = vld [vmem:[#allocation7 + $0x160] sm:$0xff]  ;;  %v69_v16 = vld [vmem:[#allocation4 + $0x8] sm:$0xff]  ;;  %v115_v21 = vld [vmem:[#allocation7 + $0xf8] sm:$0xff]  ;;  %351 = vmatprep.mubr.f32.mxu1 %v71_v17  ;;  %v883_v24 = vpack.c.bf16 %v97_v12, %v96_v11 }
  0x4b   :  { %v129_v19 = vld [vmem:[#allocation7 + $0x168] sm:$0xff]  ;;  %276 = vmatprep.mubr.f32.mxu0 %v69_v16  ;;  %v146_v22 = vld [vmem:[#allocation7 + $0x1f0] sm:$0xff]  ;;  %v147_v23 = vld [vmem:[#allocation7 + $0x1f8] sm:$0xff]  ;;  %v885_v26 = vpack.c.bf16 %v115_v21, %v114_v20 }
  0x4c   :  { %876 = vmatpush3.bf16.msra.mxu0 %v875_v62  ;;  %v915_v25 = vpack.c.bf16 %v129_v19, %v128_v15  ;;  %v98_v27 = vld [vmem:[#allocation7 + $0x70] sm:$0xff]  ;;  %v99_v28 = vld [vmem:[#allocation7 + $0x78] sm:$0xff]  ;;  %v917_v30 = vpack.c.bf16 %v147_v23, %v146_v22  ;;  %v164_v32 = vld [vmem:[#allocation7 + $0x280] sm:$0xff] }
  0x4d   :  { %908 = vmatpush3.bf16.msra.mxu1 %v907_v63  ;;  %878 = vmatprep.subr.bf16.mxu0 %v877_v0  ;;  %v130_v29 = vld [vmem:[#allocation7 + $0x170] sm:$0xff]  ;;  %v131_v31 = vld [vmem:[#allocation7 + $0x178] sm:$0xff]  ;;  %v165_v33 = vld [vmem:[#allocation7 + $0x288] sm:$0xff]  ;;  %v887_v36 = vpack.c.bf16 %v99_v28, %v98_v27 }
  0x4e   :  { %910 = vmatprep.subr.bf16.mxu1 %v909_v4  ;;  %v196_v34 = vld [vmem:[#allocation7 + $0x380] sm:$0xff]  ;;  %v197_v35 = vld [vmem:[#allocation7 + $0x388] sm:$0xff]  ;;  %v919_v37 = vpack.c.bf16 %v131_v31, %v130_v29  ;;  %v921_v38 = vpack.c.bf16 %v165_v33, %v164_v32  ;;  %v166_v44 = vld [vmem:[#allocation7 + $0x290] sm:$0xff] }
  0x4f   :  { %v148_v39 = vld [vmem:[#allocation7 + $0x200] sm:$0xff]  ;;  %v149_v40 = vld [vmem:[#allocation7 + $0x208] sm:$0xff]  ;;  %v953_v42 = vpack.c.bf16 %v197_v35, %v196_v34  ;;  %v167_v45 = vld [vmem:[#allocation7 + $0x298] sm:$0xff] }
  0x50   :  { %880 = vmatpush3.bf16.msra.mxu0 %v879_v10  ;;  %v180_v41 = vld [vmem:[#allocation7 + $0x300] sm:$0xff]  ;;  %v181_v43 = vld [vmem:[#allocation7 + $0x308] sm:$0xff]  ;;  %v198_v46 = vld [vmem:[#allocation7 + $0x390] sm:$0xff]  ;;  %v923_v50 = vpack.c.bf16 %v149_v40, %v148_v39  ;;  %v925_v52 = vpack.c.bf16 %v167_v45, %v166_v44 }
  0x51   :  { %912 = vmatpush3.bf16.msra.mxu1 %v911_v13  ;;  %882 = vmatprep.subr.bf16.mxu0 %v881_v14  ;;  %v199_v47 = vld [vmem:[#allocation7 + $0x398] sm:$0xff]  ;;  %v68_v48 = vld [vmem:[#allocation4] sm:$0xff]  ;;  %v70_v49 = vld [vmem:[#allocation4 + $0x10] sm:$0xff]  ;;  %v955_v51 = vpack.c.bf16 %v181_v43, %v180_v41 }
  0x52   :  { %914 = vmatprep.subr.bf16.mxu1 %v913_v18  ;;  %v150_v53 = vld [vmem:[#allocation7 + $0x210] sm:$0xff]  ;;  %v151_v54 = vld [vmem:[#allocation7 + $0x218] sm:$0xff]  ;;  %v957_v56 = vpack.c.bf16 %v199_v47, %v198_v46  ;;  %v168_v58 = vld [vmem:[#allocation7 + $0x2a0] sm:$0xff] }
  0x53   :  { %v182_v55 = vld [vmem:[#allocation7 + $0x310] sm:$0xff]  ;;  %v183_v57 = vld [vmem:[#allocation7 + $0x318] sm:$0xff]  ;;  %v169_v59 = vld [vmem:[#allocation7 + $0x2a8] sm:$0xff]  ;;  %v927_v62 = vpack.c.bf16 %v151_v54, %v150_v53 }
  0x54   :  { %884 = vmatpush3.bf16.msra.mxu0 %v883_v24  ;;  %v200_v60 = vld [vmem:[#allocation7 + $0x3a0] sm:$0xff]  ;;  %v201_v61 = vld [vmem:[#allocation7 + $0x3a8] sm:$0xff]  ;;  %v959_v63 = vpack.c.bf16 %v183_v57, %v182_v55  ;;  %v929_v0 = vpack.c.bf16 %v169_v59, %v168_v58  ;;  %v170_v6 = vld [vmem:[#allocation7 + $0x2b0] sm:$0xff] }
  0x55   :  { %916 = vmatpush3.bf16.msra.mxu1 %v915_v25  ;;  %886 = vmatprep.subr.bf16.mxu0 %v885_v26  ;;  %v152_v1 = vld [vmem:[#allocation7 + $0x220] sm:$0xff]  ;;  %v153_v2 = vld [vmem:[#allocation7 + $0x228] sm:$0xff]  ;;  %v961_v4 = vpack.c.bf16 %v201_v61, %v200_v60  ;;  %v171_v7 = vld [vmem:[#allocation7 + $0x2b8] sm:$0xff] }
  0x56   :  { %918 = vmatprep.subr.bf16.mxu1 %v917_v30  ;;  %v184_v3 = vld [vmem:[#allocation7 + $0x320] sm:$0xff]  ;;  %v185_v5 = vld [vmem:[#allocation7 + $0x328] sm:$0xff]  ;;  %v154_v8 = vld [vmem:[#allocation7 + $0x230] sm:$0xff]  ;;  %v931_v11 = vpack.c.bf16 %v153_v2, %v152_v1  ;;  %v933_v16 = vpack.c.bf16 %v171_v7, %v170_v6 }
  0x57   :  { %v202_v9 = vld [vmem:[#allocation7 + $0x3b0] sm:$0xff]  ;;  %v203_v10 = vld [vmem:[#allocation7 + $0x3b8] sm:$0xff]  ;;  %v77_v14 = vld [vmem:[#allocation4 + $0x48] sm:$0xff]  ;;  %v963_v15 = vpack.c.bf16 %v185_v5, %v184_v3 }
  0x58   :  { %888 = vmatpush3.bf16.msra.mxu0 %v887_v36  ;;  %v155_v12 = vld [vmem:[#allocation7 + $0x238] sm:$0xff]  ;;  %v186_v13 = vld [vmem:[#allocation7 + $0x330] sm:$0xff]  ;;  %v172_v18 = vld [vmem:[#allocation7 + $0x2c0] sm:$0xff]  ;;  %v965_v20 = vpack.c.bf16 %v203_v10, %v202_v9 }
  0x59   :  { %920 = vmatpush3.bf16.msra.mxu1 %v919_v37  ;;  %922 = vmatprep.subr.bf16.mxu0 %v921_v38  ;;  %v187_v17 = vld [vmem:[#allocation7 + $0x338] sm:$0xff]  ;;  %v173_v21 = vld [vmem:[#allocation7 + $0x2c8] sm:$0xff]  ;;  %v76_v22 = vld [vmem:[#allocation4 + $0x40] sm:$0xff]  ;;  %v935_v26 = vpack.c.bf16 %v155_v12, %v154_v8 }
  0x5a   :  { %954 = vmatprep.subr.bf16.mxu1 %v953_v42  ;;  %v79_v19 = vld [vmem:[#allocation4 + $0x58] sm:$0xff]  ;;  %v78_v23 = vld [vmem:[#allocation4 + $0x50] sm:$0xff]  ;;  %v204_v24 = vld [vmem:[#allocation7 + $0x3c0] sm:$0xff]  ;;  %v967_v29 = vpack.c.bf16 %v187_v17, %v186_v13  ;;  %v937_v30 = vpack.c.bf16 %v173_v21, %v172_v18 }
  0x5b   :  { %277 = vmatmul.mubr.f32.vlgmr.msra.gmra.mrb[0].mxu0 %v68_v48  ;;  %v205_v25 = vld [vmem:[#allocation7 + $0x3c8] sm:$0xff]  ;;  %v156_v27 = vld [vmem:[#allocation7 + $0x240] sm:$0xff]  ;;  %v174_v35 = vld [vmem:[#allocation7 + $0x2d0] sm:$0xff] }
  0x5c   :  { %352 = vmatmul.mubr.f32.vlgmr.msra.gmra.mrb[0].mxu1 %v70_v49  ;;  %924 = vmatpush3.bf16.msra.mxu0 %v923_v50  ;;  %v157_v28 = vld [vmem:[#allocation7 + $0x248] sm:$0xff]  ;;  %v188_v31 = vld [vmem:[#allocation7 + $0x340] sm:$0xff]  ;;  %v969_v34 = vpack.c.bf16 %v205_v25, %v204_v24  ;;  %v175_v36 = vld [vmem:[#allocation7 + $0x2d8] sm:$0xff] }
  0x5d   :  { %956 = vmatpush3.bf16.msra.mxu1 %v955_v51  ;;  %926 = vmatprep.subr.bf16.mxu0 %v925_v52  ;;  %v189_v32 = vld [vmem:[#allocation7 + $0x348] sm:$0xff]  ;;  %v75_v37 = vld [vmem:[#allocation4 + $0x38] sm:$0xff]  ;;  %v206_v38 = vld [vmem:[#allocation7 + $0x3d0] sm:$0xff]  ;;  %v939_v40 = vpack.c.bf16 %v157_v28, %v156_v27  ;;  %v941_v42 = vpack.c.bf16 %v175_v36, %v174_v35 }
  0x5e   :  { %958 = vmatprep.subr.bf16.mxu1 %v957_v56  ;;  %281 = vmatprep.mubr.f32.mxu0 %v77_v14  ;;  %v73_v33 = vld [vmem:[#allocation4 + $0x28] sm:$0xff]  ;;  %v207_v39 = vld [vmem:[#allocation7 + $0x3d8] sm:$0xff]  ;;  %v971_v41 = vpack.c.bf16 %v189_v32, %v188_v31  ;;  %v158_v43 = vld [vmem:[#allocation7 + $0x250] sm:$0xff] }
  0x5f   :  { %356 = vmatprep.mubr.f32.mxu1 %v79_v19  ;;  %282 = vmatmul.mubr.f32.gmra.mrb[2].mxu0 %v76_v22  ;;  %v159_v44 = vld [vmem:[#allocation7 + $0x258] sm:$0xff]  ;;  %v190_v45 = vld [vmem:[#allocation7 + $0x350] sm:$0xff]  ;;  %v973_v46 = vpack.c.bf16 %v207_v39, %v206_v38  ;;  %v176_v48 = vld [vmem:[#allocation7 + $0x2e0] sm:$0xff] }
  0x60   :  { %928 = vmatpush3.bf16.msra.mxu0 %v927_v62  ;;  %357 = vmatmul.mubr.f32.gmra.mrb[2].mxu1 %v78_v23  ;;  %v191_v47 = vld [vmem:[#allocation7 + $0x358] sm:$0xff]  ;;  %v177_v49 = vld [vmem:[#allocation7 + $0x2e8] sm:$0xff]  ;;  %v208_v50 = vld [vmem:[#allocation7 + $0x3e0] sm:$0xff]  ;;  %v943_v52 = vpack.c.bf16 %v159_v44, %v158_v43 }
  0x61   :  { %960 = vmatpush3.bf16.msra.mxu1 %v959_v63  ;;  %930 = vmatprep.subr.bf16.mxu0 %v929_v0  ;;  %v209_v51 = vld [vmem:[#allocation7 + $0x3e8] sm:$0xff]  ;;  %v975_v53 = vpack.c.bf16 %v191_v47, %v190_v45  ;;  %v945_v54 = vpack.c.bf16 %v177_v49, %v176_v48  ;;  %v160_v55 = vld [vmem:[#allocation7 + $0x260] sm:$0xff]  ;;  %v178_v60 = vld [vmem:[#allocation7 + $0x2f0] sm:$0xff] }
  0x62   :  { %962 = vmatprep.subr.bf16.mxu1 %v961_v4  ;;  %426 = vmatprep.mubr.f32.mxu0 %v73_v33  ;;  %v161_v56 = vld [vmem:[#allocation7 + $0x268] sm:$0xff]  ;;  %v192_v57 = vld [vmem:[#allocation7 + $0x360] sm:$0xff]  ;;  %v977_v58 = vpack.c.bf16 %v209_v51, %v208_v50  ;;  %v179_v61 = vld [vmem:[#allocation7 + $0x2f8] sm:$0xff] }
  0x63   :  { %501 = vmatprep.mubr.f32.mxu1 %v75_v37  ;;  %v193_v59 = vld [vmem:[#allocation7 + $0x368] sm:$0xff]  ;;  %v210_v62 = vld [vmem:[#allocation7 + $0x3f0] sm:$0xff]  ;;  %v211_v63 = vld [vmem:[#allocation7 + $0x3f8] sm:$0xff]  ;;  %v947_v0 = vpack.c.bf16 %v161_v56, %v160_v55  ;;  %v949_v2 = vpack.c.bf16 %v179_v61, %v178_v60 }
  0x64   :  { %932 = vmatpush3.bf16.msra.mxu0 %v931_v11  ;;  %v979_v1 = vpack.c.bf16 %v193_v59, %v192_v57  ;;  %v162_v3 = vld [vmem:[#allocation7 + $0x270] sm:$0xff]  ;;  %v163_v4 = vld [vmem:[#allocation7 + $0x278] sm:$0xff]  ;;  %v981_v5 = vpack.c.bf16 %v211_v63, %v210_v62  ;;  %v72_v10 = vld [vmem:[#allocation4 + $0x20] sm:$0xff] }
  0x65   :  { %964 = vmatpush3.bf16.msra.mxu1 %v963_v15  ;;  %934 = vmatprep.subr.bf16.mxu0 %v933_v16  ;;  %v194_v6 = vld [vmem:[#allocation7 + $0x370] sm:$0xff]  ;;  %v195_v7 = vld [vmem:[#allocation7 + $0x378] sm:$0xff]  ;;  %v951_v8 = vpack.c.bf16 %v163_v4, %v162_v3  ;;  %v81_v12 = vld [vmem:[#allocation4 + $0x68] sm:$0xff]  ;;  %v532_v16 = vstv %s1220_s0 }
  0x66   :  { %966 = vmatprep.subr.bf16.mxu1 %v965_v20  ;;  %v983_v9 = vpack.c.bf16 %v195_v7, %v194_v6  ;;  %v74_v11 = vld [vmem:[#allocation4 + $0x30] sm:$0xff]  ;;  %v83_v13 = vld [vmem:[#allocation4 + $0x78] sm:$0xff]  ;;  %v80_v14 = vld [vmem:[#allocation4 + $0x60] sm:$0xff]  ;;  %v533_v20 = vmul.f32 1.442695, %v532_v16 }
  0x67   :  { %v82_v15 = vld [vmem:[#allocation4 + $0x70] sm:$0xff]  ;;  %v541_v17 = vld [vmem:[#allocation9] sm:$0xff]  ;;  %v542_v18 = vld [vmem:[#allocation9 + $0x8] sm:$0xff] }
  0x68   :  { %936 = vmatpush3.bf16.msra.mxu0 %v935_v26  ;;  %v543_v19 = vld [vmem:[#allocation9 + $0x10] sm:$0xff]  ;;  %v985_v21 = vpack.c.bf16 %v542_v18, %v541_v17  ;;  %v544_v22 = vld [vmem:[#allocation9 + $0x18] sm:$0xff]  ;;  %v545_v24 = vld [vmem:[#allocation9 + $0x20] sm:$0xff]  ;;  %1027 = vpow2.f32 %v533_v20 }
  0x69   :  { %968 = vmatpush3.bf16.msra.mxu1 %v967_v29  ;;  %938 = vmatprep.subr.bf16.mxu0 %v937_v30  ;;  %v989_v23 = vpack.c.bf16 %v544_v22, %v543_v19  ;;  %v546_v25 = vld [vmem:[#allocation9 + $0x28] sm:$0xff]  ;;  %v547_v60 = vld [vmem:[#allocation9 + $0x30] sm:$0xff]  ;;  %v548_v61 = vld [vmem:[#allocation9 + $0x38] sm:$0xff] }
  0x6a   :  { %970 = vmatprep.subr.bf16.mxu1 %v969_v34  ;;  %v993_v26 = vpack.c.bf16 %v546_v25, %v545_v24  ;;  %v997_v62 = vpack.c.bf16 %v548_v61, %v547_v60  ;;  %v549_v63 = vld [vmem:[#allocation9 + $0x40] sm:$0xff]  ;;  %v552_v3 = vld [vmem:[#allocation9 + $0x58] sm:$0xff]  ;;  %v554_v6 = vld [vmem:[#allocation9 + $0x68] sm:$0xff] }
  0x6c   :  { %940 = vmatpush3.bf16.msra.mxu0 %v939_v40 }
  0x6d   :  { %972 = vmatpush3.bf16.msra.mxu1 %v971_v41  ;;  %942 = vmatprep.subr.bf16.mxu0 %v941_v42 }
  0x6e   :  { %974 = vmatprep.subr.bf16.mxu1 %v973_v46 }
  0x70   :  { %944 = vmatpush3.bf16.msra.mxu0 %v943_v52 }
  0x71   :  { %976 = vmatpush3.bf16.msra.mxu1 %v975_v53  ;;  %946 = vmatprep.subr.bf16.mxu0 %v945_v54 }
  0x72   :  { %978 = vmatprep.subr.bf16.mxu1 %v977_v58  ;;  %v1028_v27 = vpop.eup %1027 }
  0x73   :  { %1017 = vpush %v1028_v27 }
  0x74   :  { %948 = vmatpush3.bf16.msra.mxu0 %v947_v0  ;;  %v550_v0 = vld [vmem:[#allocation9 + $0x48] sm:$0xff] }
  0x75   :  { %980 = vmatpush3.bf16.msra.mxu1 %v979_v1  ;;  %950 = vmatprep.subr.bf16.mxu0 %v949_v2  ;;  %v1001_v1 = vpack.c.bf16 %v550_v0, %v549_v63  ;;  %v551_v2 = vld [vmem:[#allocation9 + $0x50] sm:$0xff] }
  0x76   :  { %982 = vmatprep.subr.bf16.mxu1 %v981_v5  ;;  %v1005_v4 = vpack.c.bf16 %v552_v3, %v551_v2  ;;  %v553_v5 = vld [vmem:[#allocation9 + $0x60] sm:$0xff] }
  0x77   :  { %v1009_v7 = vpack.c.bf16 %v554_v6, %v553_v5 }
  0x78   :  { %952 = vmatpush3.bf16.msra.mxu0 %v951_v8  ;;  %v555_v8 = vld [vmem:[#allocation9 + $0x70] sm:$0xff] }
  0x79   :  { %984 = vmatpush3.bf16.msra.mxu1 %v983_v9  ;;  %986 = vmatprep.subr.bf16.mxu0 %v985_v21  ;;  %v556_v9 = vld [vmem:[#allocation9 + $0x78] sm:$0xff] }
  0x7b   :  { %427 = vmatmul.mubr.f32.vlgmr.msra.gmra.mrb[4].mxu0 %v72_v10  ;;  %v1013_v10 = vpack.c.bf16 %v556_v9, %v555_v8 }
  0x7c   :  { %502 = vmatmul.mubr.f32.vlgmr.msra.gmra.mrb[4].mxu1 %v74_v11  ;;  %431 = vmatprep.mubr.f32.mxu0 %v81_v12 }
  0x7d   :  { %506 = vmatprep.mubr.f32.mxu1 %v83_v13  ;;  %988 = vmatpush3.bf16.msra.mxu0 %v985_v21 }
  0x7e   :  { %990 = vmatprep.subr.bf16.mxu0 %v989_v23 }
  0x7f   :  { %432 = vmatmul.mubr.f32.gmra.mrb[6].mxu0 %v80_v14 }
  0x80   :  { %507 = vmatmul.mubr.f32.gmra.mrb[6].mxu1 %v82_v15 }
  0x81   :  { %992 = vmatpush3.bf16.msra.mxu0 %v989_v23 }
  0x82   :  { %994 = vmatprep.subr.bf16.mxu0 %v993_v26 }
  0x85   :  { %996 = vmatpush3.bf16.msra.mxu0 %v993_v26 }
  0x86   :  { %998 = vmatprep.subr.bf16.mxu0 %v997_v62 }
  0x89   :  { %1000 = vmatpush3.bf16.msra.mxu0 %v997_v62 }
  0x8a   :  { %1002 = vmatprep.subr.bf16.mxu0 %v1001_v1 }
  0x8d   :  { %1004 = vmatpush3.bf16.msra.mxu0 %v1001_v1 }
  0x8e   :  { %1006 = vmatprep.subr.bf16.mxu0 %v1005_v4 }
  0x91   :  { %1008 = vmatpush3.bf16.msra.mxu0 %v1005_v4 }
  0x92   :  { %1010 = vmatprep.subr.bf16.mxu0 %v1009_v7 }
  0x95   :  { %1012 = vmatpush3.bf16.msra.mxu0 %v1009_v7 }
  0x96   :  { %1014 = vmatprep.subr.bf16.mxu0 %v1013_v10 }
  0x99   :  { %1016 = vmatpush3.bf16.msra.mxu0 %v1013_v10 }
  0xa4   :  { %s1018_s0 = spop %1017 }
  0xa5   :  { %v536_v15 = vstv %s1018_s0 }
 0x12e   :  { %v684_v28 = vpop.f32.mrb[0].mxu0 }
 0x12f   :  { %v722_v29 = vpop.f32.mrb[0].mxu1  ;;  %v685_v30 = vpop.f32.mrb[1].mxu0 }
 0x130   :  { %v686_v31 = vadd.f32 %v685_v30, %v684_v28  ;;  %v723_v32 = vpop.f32.mrb[1].mxu1 }
 0x131   :  { %v724_v33 = vadd.f32 %v723_v32, %v722_v29 }
 0x132   :  { %v687_v35 = vpop.f32.mrb[2].mxu0 }
 0x133   :  { %v354_v34 = vadd.f32 %v724_v33, %v686_v31  ;;  %v725_v36 = vpop.f32.mrb[2].mxu1  ;;  %v688_v37 = vpop.f32.mrb[3].mxu0 }
 0x134   :  { %v689_v38 = vadd.f32 %v688_v37, %v687_v35  ;;  %v726_v39 = vpop.f32.mrb[3].mxu1 }
 0x135   :  { %v727_v40 = vadd.f32 %v726_v39, %v725_v36 }
 0x137   :  { %v359_v41 = vadd.f32 %v727_v40, %v689_v38 }
 0x14e   :  { %v760_v42 = vpop.f32.mrb[4].mxu0 }
 0x14f   :  { %v761_v43 = vpop.f32.mrb[5].mxu0  ;;  %v798_v44 = vpop.f32.mrb[4].mxu1 }
 0x150   :  { %v762_v45 = vadd.f32 %v761_v43, %v760_v42  ;;  %v799_v46 = vpop.f32.mrb[5].mxu1 }
 0x151   :  { %v800_v47 = vadd.f32 %v799_v46, %v798_v44 }
 0x152   :  { %v429_v48 = vadd.f32 %v762_v45, %v354_v34  ;;  %v763_v49 = vpop.f32.mrb[6].mxu0 }
 0x153   :  { %v764_v50 = vpop.f32.mrb[7].mxu0  ;;  %v801_v51 = vpop.f32.mrb[6].mxu1 }
 0x154   :  { %v765_v52 = vadd.f32 %v764_v50, %v763_v49  ;;  %v802_v53 = vpop.f32.mrb[7].mxu1  ;;  %v504_v54 = vadd.f32 %v800_v47, %v429_v48 }
 0x155   :  { %v803_v55 = vadd.f32 %v802_v53, %v801_v51 }
 0x156   :  { %v434_v56 = vadd.f32 %v765_v52, %v359_v41  ;;  %v521_v57 = vmul.f32 %v504_v54, %v504_v54 }
 0x158   :  { %v509_v58 = vadd.f32 %v803_v55, %v434_v56  ;;  %523 = vadd.xlane.f32.xlu0 %v521_v57 }
 0x15a   :  { %v522_v59 = vmul.f32 %v509_v58, %v509_v58 }
 0x15c   :  { %525 = vadd.xlane.f32.xlu0 %v522_v59 }
 0x1e5   :  { %v524_v11 = vpop.xlane.xlu0 %523 }
 0x1e6   :  { %v527_v12 = vmax.f32 %v524_v11, 1e-12 }
 0x1e8   :  { %1029 = vrsqrt.f32 %v527_v12 }
 0x1e9   :  { %v526_v13 = vpop.xlane.xlu0 %525 }
 0x1ea   :  { %v528_v14 = vmax.f32 %v526_v13, 1e-12 }
 0x1ec   :  { %1031 = vrsqrt.f32 %v528_v14 }
 0x1f2   :  { %v1030_v16 = vpop.eup %1029 }
 0x1f3   :  { %v537_v17 = vmul.f32 %v1030_v16, %v536_v15 }
 0x1f5   :  { %v539_v18 = vmul.f32 %v537_v17, %v504_v54 }
 0x1f6   :  { %v1032_v19 = vpop.eup %1031 }
 0x1f7   :  { %v538_v20 = vmul.f32 %v1032_v19, %v536_v15  ;;  %854 = vmatprep.mubr.f32.mxu0 %v539_v18 }
 0x1f9   :  { %v540_v21 = vmul.f32 %v538_v20, %v509_v58 }
 0x1fb   :  { %855 = vmatmul.mubr.f32.vlgmr.msra.gmra.mrb[8].mxu0 %v540_v21 }
 0x2ce   :  { %v856_v22 = vpop.f32.mrb[8].mxu0 }
 0x2cf   :  { %633 = vst [vmem:[#allocation10 + $0x8] sm:$0xff] %v856_v22  ;;  %v623_v23 = vpop.f32.mrb[9].mxu0 }
 0x2d0   :  { %632 = vst [vmem:[#allocation10] sm:$0xff] %v623_v23 }
 0x2d1   :  { %1110 = shalt.err (!%p1107_p0)
}
 0x2d2   :  { %s1111_s9 = scalar_lea.hbm %s1224_s4, 256 }
 0x2d3   :  { %p1112_p1 = scmp.ne.s32.totalorder %s1224_s4, %s1111_s9  ;;  %p1115_p2 = scmp.lt.u32.totalorder %s1111_s9, %s1224_s4 }
 0x2d5   :  { %p1117_p3 = pnand %p1115_p2, %p1112_p1 }
 0x2d7   :  { %1120 = shalt.err (!%p1117_p3)
}
 0x2d8   :  { %645 = dma.vmem_to_hbm [thread:$0]  %s640_s5, 256, %s1224_s4, [#allocation6], %s1128_s25, %s1128_s25, %s1129_s26  }
 0x2d9   :  { %1125 = dma.done.wait [#allocation6], 256  }
 0x2da   :  { %1126 = vsyncadd [#allocation6], 4294967040 }
 0x2db   :  { %649 = vsyncpa [#allocation5], 1 }
 0x2dc   :  { %650 = vsyncpa [#allocation8], 1 }
 0x2dd   :  { %651 = vsyncpa [#allocation6], 1 }

// kernel: tpu_custom_call.1
= control target key start
LH: loop header
LB: loop body
LE: loop exit
PB: predicated region body
PF: predicated region fallthrough
CT: control target
= control target key end

     0   :  { %10 = vsyncpa [#allocation5], 0  ;;  %s1220_s0 = inlined_call_operand.<no memory space> [shape: f32[1,1], index: 0, kind: input, shape index: {}]   ;;  %s1221_s1 = inlined_call_operand.hbm [shape: f32[16,1024], index: 1, kind: input, shape index: {}]   ;;  %s1222_s2 = inlined_call_operand.hbm [shape: f32[1024,128], index: 2, kind: input, shape index: {}]   ;;  %s1223_s3 = inlined_call_operand.hbm [shape: f32[128,128], index: 3, kind: input, shape index: {}]   ;;  %s1224_s4 = inlined_call_operand.hbm [shape: f32[16,128], index: 4, kind: output, shape index: {}]  }
   0x1   :  { %11 = vsyncpa [#allocation8], 0 }
   0x2   :  { %12 = vsyncpa [#allocation6], 0  ;;  %s1127_s15 = smov [#allocation7]   ;;  %s1033_s19 = scalar_lea.hbm %s1222_s2, 16384 }
   0x3   :  { %s32_s16 = sshll.u32 %s1127_s15, 4  ;;  %p1034_p0 = scmp.ne.s32.totalorder %s1222_s2, %s1033_s19  ;;  %s33_s16 = int_to_ptr.vmem [resolvable:$true] %s32_s16 }
   0x4   :  { %p1037_p1 = scmp.lt.u32.totalorder %s1033_s19, %s1222_s2 }
   0x6   :  { %p1039_p2 = pnand %p1037_p1, %p1034_p0 }
   0x8   :  { %1042 = shalt.err (!%p1039_p2)
}
   0x9   :  { %s1043_s24 = scalar_lea.vmem %s33_s16, 16384  ;;  %p1048_p4 = scmp.lt.s32.totalorder %s33_s16, %s33_s16 }
   0xa   :  { %p1044_p3 = scmp.ne.s32.totalorder %s33_s16, %s1043_s24  ;;  %p1049_p5 = scmp.lt.s32.totalorder %s1043_s24, %s1043_s24 }
   0xc   :  { %p1050_p6 = por %p1049_p5, %p1048_p4 }
   0xe   :  { %p1051_p7 = pnand %p1050_p6, %p1044_p3 }
  0x10   :  { %1054 = shalt.err (!%p1051_p7)
}
  0x11   :  { %s1128_s25 = smov 128   ;;  %s1129_s26 = smov 8  }
  0x12   :  { %38 = dma.hbm_to_vmem [thread:$0]  %s1222_s2, 16384, %s33_s16, [#allocation8], %s1128_s25, %s1128_s25, %s1129_s26  }
  0x13   :  { %s1130_s29 = smov [#allocation4]   ;;  %s1055_s7 = scalar_lea.hbm %s1221_s1, 2048 }
  0x14   :  { %s20_s30 = sshll.u32 %s1130_s29, 4  ;;  %p1056_p8 = scmp.ne.s32.totalorder %s1221_s1, %s1055_s7  ;;  %s21_s30 = int_to_ptr.vmem [resolvable:$true] %s20_s30 }
  0x15   :  { %p1059_p9 = scmp.lt.u32.totalorder %s1055_s7, %s1221_s1 }
  0x17   :  { %p1061_p10 = pnand %p1059_p9, %p1056_p8 }
  0x19   :  { %1064 = shalt.err (!%p1061_p10)
}
  0x1a   :  { %s1065_s12 = scalar_lea.vmem %s21_s30, 2048  ;;  %p1070_p12 = scmp.lt.s32.totalorder %s21_s30, %s21_s30 }
  0x1b   :  { %p1066_p11 = scmp.ne.s32.totalorder %s21_s30, %s1065_s12  ;;  %p1071_p13 = scmp.lt.s32.totalorder %s1065_s12, %s1065_s12 }
  0x1d   :  { %p1072_p0 = por %p1071_p13, %p1070_p12 }
  0x1f   :  { %p1073_p1 = pnand %p1072_p0, %p1066_p11 }
  0x21   :  { %1076 = shalt.err (!%p1073_p1)
}
  0x22   :  { %s1131_s2 = smov 1024   ;;  %s1132_s13 = smov 64  }
  0x23   :  { %26 = dma.hbm_to_vmem [thread:$0]  %s1221_s1, 2048, %s21_s30, [#allocation5], %s1131_s2, %s1131_s2, %s1132_s13  }
  0x24   :  { %s1133_s16 = smov [#allocation9]   ;;  %s1077_s20 = scalar_lea.hbm %s1223_s3, 2048 }
  0x25   :  { %s44_s17 = sshll.u32 %s1133_s16, 4  ;;  %p1078_p2 = scmp.ne.s32.totalorder %s1223_s3, %s1077_s20  ;;  %s45_s17 = int_to_ptr.vmem [resolvable:$true] %s44_s17 }
  0x26   :  { %p1081_p3 = scmp.lt.u32.totalorder %s1077_s20, %s1223_s3 }
  0x28   :  { %p1083_p4 = pnand %p1081_p3, %p1078_p2 }
  0x2a   :  { %1086 = shalt.err (!%p1083_p4)
}
  0x2b   :  { %s1087_s27 = scalar_lea.vmem %s45_s17, 2048  ;;  %p1092_p6 = scmp.lt.s32.totalorder %s45_s17, %s45_s17 }
  0x2c   :  { %p1088_p5 = scmp.ne.s32.totalorder %s45_s17, %s1087_s27  ;;  %p1093_p7 = scmp.lt.s32.totalorder %s1087_s27, %s1087_s27 }
  0x2e   :  { %p1094_p8 = por %p1093_p7, %p1092_p6 }
  0x30   :  { %p1095_p9 = pnand %p1094_p8, %p1088_p5 }
  0x32   :  { %1098 = shalt.err (!%p1095_p9)
}
  0x33   :  { %50 = dma.hbm_to_vmem [thread:$0]  %s1223_s3, 2048, %s45_s17, [#allocation8], %s1128_s25, %s1128_s25, %s1129_s26  }
  0x34   :  { %1121 = dma.done.wait [#allocation5], 2048  }
  0x35   :  { %1122 = vsyncadd [#allocation5], 4294965248 }
  0x36   :  { %1123 = dma.done.wait [#allocation8], 18432  }
  0x37   :  { %1124 = vsyncadd [#allocation8], 4294948864  ;;  %v100_v0 = vld [vmem:[#allocation7 + $0x80] sm:$0xff]  ;;  %v101_v1 = vld [vmem:[#allocation7 + $0x88] sm:$0xff]  ;;  %s1134_s30 = smov [#allocation10]  }
  0x38   :  { %v132_v2 = vld [vmem:[#allocation7 + $0x180] sm:$0xff]  ;;  %v857_v3 = vpack.c.bf16 %v101_v1, %v100_v0  ;;  %v133_v4 = vld [vmem:[#allocation7 + $0x188] sm:$0xff]  ;;  %v102_v11 = vld [vmem:[#allocation7 + $0x90] sm:$0xff]  ;;  %s639_s5 = sshll.u32 %s1134_s30, 4  ;;  %s640_s5 = int_to_ptr.vmem [resolvable:$true] %s639_s5 }
  0x39   :  { %v84_v5 = vld [vmem:[#allocation7] sm:$0xff]  ;;  %v85_v6 = vld [vmem:[#allocation7 + $0x8] sm:$0xff]  ;;  %v889_v7 = vpack.c.bf16 %v133_v4, %v132_v2  ;;  %v103_v13 = vld [vmem:[#allocation7 + $0x98] sm:$0xff]  ;;  %s1099_s6 = scalar_lea.vmem %s640_s5, 256  ;;  %p1104_p11 = scmp.lt.s32.totalorder %s640_s5, %s640_s5 }
  0x3a   :  { %v859_v8 = vpack.c.bf16 %v85_v6, %v84_v5  ;;  %v116_v9 = vld [vmem:[#allocation7 + $0x100] sm:$0xff]  ;;  %v117_v10 = vld [vmem:[#allocation7 + $0x108] sm:$0xff]  ;;  %858 = vmatprep.subr.bf16.mxu0 %v857_v3  ;;  %v134_v14 = vld [vmem:[#allocation7 + $0x190] sm:$0xff]  ;;  %v861_v16 = vpack.c.bf16 %v103_v13, %v102_v11  ;;  %p1100_p10 = scmp.ne.s32.totalorder %s640_s5, %s1099_s6  ;;  %p1105_p12 = scmp.lt.s32.totalorder %s1099_s6, %s1099_s6 }
  0x3b   :  { %v891_v12 = vpack.c.bf16 %v117_v10, %v116_v9  ;;  %v135_v15 = vld [vmem:[#allocation7 + $0x198] sm:$0xff]  ;;  %890 = vmatprep.subr.bf16.mxu1 %v889_v7  ;;  %v86_v18 = vld [vmem:[#allocation7 + $0x10] sm:$0xff]  ;;  %v104_v23 = vld [vmem:[#allocation7 + $0xa0] sm:$0xff] }
  0x3c   :  { %860 = vmatpush3.bf16.msra.mxu0 %v859_v8  ;;  %v893_v17 = vpack.c.bf16 %v135_v15, %v134_v14  ;;  %v87_v19 = vld [vmem:[#allocation7 + $0x18] sm:$0xff]  ;;  %v118_v20 = vld [vmem:[#allocation7 + $0x110] sm:$0xff]  ;;  %v105_v24 = vld [vmem:[#allocation7 + $0xa8] sm:$0xff]  ;;  %p1106_p13 = por %p1105_p12, %p1104_p11 }
  0x3d   :  { %892 = vmatpush3.bf16.msra.mxu1 %v891_v12  ;;  %v863_v21 = vpack.c.bf16 %v87_v19, %v86_v18  ;;  %v119_v22 = vld [vmem:[#allocation7 + $0x118] sm:$0xff]  ;;  %862 = vmatprep.subr.bf16.mxu0 %v861_v16  ;;  %v865_v26 = vpack.c.bf16 %v105_v24, %v104_v23  ;;  %v136_v27 = vld [vmem:[#allocation7 + $0x1a0] sm:$0xff]  ;;  %v137_v28 = vld [vmem:[#allocation7 + $0x1a8] sm:$0xff] }
  0x3e   :  { %894 = vmatprep.subr.bf16.mxu1 %v893_v17  ;;  %v895_v25 = vpack.c.bf16 %v119_v22, %v118_v20  ;;  %v88_v29 = vld [vmem:[#allocation7 + $0x20] sm:$0xff]  ;;  %v897_v30 = vpack.c.bf16 %v137_v28, %v136_v27  ;;  %v89_v31 = vld [vmem:[#allocation7 + $0x28] sm:$0xff]  ;;  %v106_v35 = vld [vmem:[#allocation7 + $0xb0] sm:$0xff]  ;;  %p1107_p0 = pnand %p1106_p13, %p1100_p10 }
  0x3f   :  { %v120_v32 = vld [vmem:[#allocation7 + $0x120] sm:$0xff]  ;;  %v121_v33 = vld [vmem:[#allocation7 + $0x128] sm:$0xff]  ;;  %v867_v34 = vpack.c.bf16 %v89_v31, %v88_v29  ;;  %v107_v36 = vld [vmem:[#allocation7 + $0xb8] sm:$0xff] }
  0x40   :  { %864 = vmatpush3.bf16.msra.mxu0 %v863_v21  ;;  %v138_v37 = vld [vmem:[#allocation7 + $0x1b0] sm:$0xff]  ;;  %v899_v38 = vpack.c.bf16 %v121_v33, %v120_v32  ;;  %v869_v39 = vpack.c.bf16 %v107_v36, %v106_v35  ;;  %v139_v40 = vld [vmem:[#allocation7 + $0x1b8] sm:$0xff]  ;;  %v108_v46 = vld [vmem:[#allocation7 + $0xc0] sm:$0xff] }
  0x41   :  { %896 = vmatpush3.bf16.msra.mxu1 %v895_v25  ;;  %866 = vmatprep.subr.bf16.mxu0 %v865_v26  ;;  %v90_v41 = vld [vmem:[#allocation7 + $0x30] sm:$0xff]  ;;  %v91_v42 = vld [vmem:[#allocation7 + $0x38] sm:$0xff]  ;;  %v901_v43 = vpack.c.bf16 %v139_v40, %v138_v37  ;;  %v109_v47 = vld [vmem:[#allocation7 + $0xc8] sm:$0xff] }
  0x42   :  { %898 = vmatprep.subr.bf16.mxu1 %v897_v30  ;;  %v122_v44 = vld [vmem:[#allocation7 + $0x130] sm:$0xff]  ;;  %v123_v45 = vld [vmem:[#allocation7 + $0x138] sm:$0xff]  ;;  %v140_v48 = vld [vmem:[#allocation7 + $0x1c0] sm:$0xff]  ;;  %v871_v50 = vpack.c.bf16 %v91_v42, %v90_v41  ;;  %v873_v52 = vpack.c.bf16 %v109_v47, %v108_v46 }
  0x43   :  { %v141_v49 = vld [vmem:[#allocation7 + $0x1c8] sm:$0xff]  ;;  %v903_v51 = vpack.c.bf16 %v123_v45, %v122_v44  ;;  %v92_v53 = vld [vmem:[#allocation7 + $0x40] sm:$0xff]  ;;  %v110_v58 = vld [vmem:[#allocation7 + $0xd0] sm:$0xff] }
  0x44   :  { %868 = vmatpush3.bf16.msra.mxu0 %v867_v34  ;;  %v93_v54 = vld [vmem:[#allocation7 + $0x48] sm:$0xff]  ;;  %v124_v55 = vld [vmem:[#allocation7 + $0x140] sm:$0xff]  ;;  %v905_v56 = vpack.c.bf16 %v141_v49, %v140_v48  ;;  %v111_v59 = vld [vmem:[#allocation7 + $0xd8] sm:$0xff] }
  0x45   :  { %900 = vmatpush3.bf16.msra.mxu1 %v899_v38  ;;  %870 = vmatprep.subr.bf16.mxu0 %v869_v39  ;;  %v125_v57 = vld [vmem:[#allocation7 + $0x148] sm:$0xff]  ;;  %v142_v60 = vld [vmem:[#allocation7 + $0x1d0] sm:$0xff]  ;;  %v143_v61 = vld [vmem:[#allocation7 + $0x1d8] sm:$0xff]  ;;  %v875_v62 = vpack.c.bf16 %v93_v54, %v92_v53  ;;  %v877_v0 = vpack.c.bf16 %v111_v59, %v110_v58 }
  0x46   :  { %902 = vmatprep.subr.bf16.mxu1 %v901_v43  ;;  %v907_v63 = vpack.c.bf16 %v125_v57, %v124_v55  ;;  %v94_v1 = vld [vmem:[#allocation7 + $0x50] sm:$0xff]  ;;  %v95_v2 = vld [vmem:[#allocation7 + $0x58] sm:$0xff]  ;;  %v909_v4 = vpack.c.bf16 %v143_v61, %v142_v60  ;;  %v112_v6 = vld [vmem:[#allocation7 + $0xe0] sm:$0xff] }
  0x47   :  { %v126_v3 = vld [vmem:[#allocation7 + $0x150] sm:$0xff]  ;;  %v127_v5 = vld [vmem:[#allocation7 + $0x158] sm:$0xff]  ;;  %v113_v7 = vld [vmem:[#allocation7 + $0xe8] sm:$0xff]  ;;  %v879_v10 = vpack.c.bf16 %v95_v2, %v94_v1 }
  0x48   :  { %872 = vmatpush3.bf16.msra.mxu0 %v871_v50  ;;  %v144_v8 = vld [vmem:[#allocation7 + $0x1e0] sm:$0xff]  ;;  %v145_v9 = vld [vmem:[#allocation7 + $0x1e8] sm:$0xff]  ;;  %v911_v13 = vpack.c.bf16 %v127_v5, %v126_v3  ;;  %v881_v14 = vpack.c.bf16 %v113_v7, %v112_v6  ;;  %v71_v17 = vld [vmem:[#allocation4 + $0x18] sm:$0xff] }
  0x49   :  { %904 = vmatpush3.bf16.msra.mxu1 %v903_v51  ;;  %874 = vmatprep.subr.bf16.mxu0 %v873_v52  ;;  %v96_v11 = vld [vmem:[#allocation7 + $0x60] sm:$0xff]  ;;  %v97_v12 = vld [vmem:[#allocation7 + $0x68] sm:$0xff]  ;;  %v913_v18 = vpack.c.bf16 %v145_v9, %v144_v8  ;;  %v114_v20 = vld [vmem:[#allocation7 + $0xf0] sm:$0xff] }
  0x4a   :  { %906 = vmatprep.subr.bf16.mxu1 %v905_v56  ;;  %v128_v15 = vld [vmem:[#allocation7 + $0x160] sm:$0xff]  ;;  %v69_v16 = vld [vmem:[#allocation4 + $0x8] sm:$0xff]  ;;  %v115_v21 = vld [vmem:[#allocation7 + $0xf8] sm:$0xff]  ;;  %351 = vmatprep.mubr.f32.mxu1 %v71_v17  ;;  %v883_v24 = vpack.c.bf16 %v97_v12, %v96_v11 }
  0x4b   :  { %v129_v19 = vld [vmem:[#allocation7 + $0x168] sm:$0xff]  ;;  %276 = vmatprep.mubr.f32.mxu0 %v69_v16  ;;  %v146_v22 = vld [vmem:[#allocation7 + $0x1f0] sm:$0xff]  ;;  %v147_v23 = vld [vmem:[#allocation7 + $0x1f8] sm:$0xff]  ;;  %v885_v26 = vpack.c.bf16 %v115_v21, %v114_v20 }
  0x4c   :  { %876 = vmatpush3.bf16.msra.mxu0 %v875_v62  ;;  %v915_v25 = vpack.c.bf16 %v129_v19, %v128_v15  ;;  %v98_v27 = vld [vmem:[#allocation7 + $0x70] sm:$0xff]  ;;  %v99_v28 = vld [vmem:[#allocation7 + $0x78] sm:$0xff]  ;;  %v917_v30 = vpack.c.bf16 %v147_v23, %v146_v22  ;;  %v164_v32 = vld [vmem:[#allocation7 + $0x280] sm:$0xff] }
  0x4d   :  { %908 = vmatpush3.bf16.msra.mxu1 %v907_v63  ;;  %878 = vmatprep.subr.bf16.mxu0 %v877_v0  ;;  %v130_v29 = vld [vmem:[#allocation7 + $0x170] sm:$0xff]  ;;  %v131_v31 = vld [vmem:[#allocation7 + $0x178] sm:$0xff]  ;;  %v165_v33 = vld [vmem:[#allocation7 + $0x288] sm:$0xff]  ;;  %v887_v36 = vpack.c.bf16 %v99_v28, %v98_v27 }
  0x4e   :  { %910 = vmatprep.subr.bf16.mxu1 %v909_v4  ;;  %v196_v34 = vld [vmem:[#allocation7 + $0x380] sm:$0xff]  ;;  %v197_v35 = vld [vmem:[#allocation7 + $0x388] sm:$0xff]  ;;  %v919_v37 = vpack.c.bf16 %v131_v31, %v130_v29  ;;  %v921_v38 = vpack.c.bf16 %v165_v33, %v164_v32  ;;  %v166_v44 = vld [vmem:[#allocation7 + $0x290] sm:$0xff] }
  0x4f   :  { %v148_v39 = vld [vmem:[#allocation7 + $0x200] sm:$0xff]  ;;  %v149_v40 = vld [vmem:[#allocation7 + $0x208] sm:$0xff]  ;;  %v953_v42 = vpack.c.bf16 %v197_v35, %v196_v34  ;;  %v167_v45 = vld [vmem:[#allocation7 + $0x298] sm:$0xff] }
  0x50   :  { %880 = vmatpush3.bf16.msra.mxu0 %v879_v10  ;;  %v180_v41 = vld [vmem:[#allocation7 + $0x300] sm:$0xff]  ;;  %v181_v43 = vld [vmem:[#allocation7 + $0x308] sm:$0xff]  ;;  %v198_v46 = vld [vmem:[#allocation7 + $0x390] sm:$0xff]  ;;  %v923_v50 = vpack.c.bf16 %v149_v40, %v148_v39  ;;  %v925_v52 = vpack.c.bf16 %v167_v45, %v166_v44 }
  0x51   :  { %912 = vmatpush3.bf16.msra.mxu1 %v911_v13  ;;  %882 = vmatprep.subr.bf16.mxu0 %v881_v14  ;;  %v199_v47 = vld [vmem:[#allocation7 + $0x398] sm:$0xff]  ;;  %v68_v48 = vld [vmem:[#allocation4] sm:$0xff]  ;;  %v70_v49 = vld [vmem:[#allocation4 + $0x10] sm:$0xff]  ;;  %v955_v51 = vpack.c.bf16 %v181_v43, %v180_v41 }
  0x52   :  { %914 = vmatprep.subr.bf16.mxu1 %v913_v18  ;;  %v150_v53 = vld [vmem:[#allocation7 + $0x210] sm:$0xff]  ;;  %v151_v54 = vld [vmem:[#allocation7 + $0x218] sm:$0xff]  ;;  %v957_v56 = vpack.c.bf16 %v199_v47, %v198_v46  ;;  %v168_v58 = vld [vmem:[#allocation7 + $0x2a0] sm:$0xff] }
  0x53   :  { %v182_v55 = vld [vmem:[#allocation7 + $0x310] sm:$0xff]  ;;  %v183_v57 = vld [vmem:[#allocation7 + $0x318] sm:$0xff]  ;;  %v169_v59 = vld [vmem:[#allocation7 + $0x2a8] sm:$0xff]  ;;  %v927_v62 = vpack.c.bf16 %v151_v54, %v150_v53 }
  0x54   :  { %884 = vmatpush3.bf16.msra.mxu0 %v883_v24  ;;  %v200_v60 = vld [vmem:[#allocation7 + $0x3a0] sm:$0xff]  ;;  %v201_v61 = vld [vmem:[#allocation7 + $0x3a8] sm:$0xff]  ;;  %v959_v63 = vpack.c.bf16 %v183_v57, %v182_v55  ;;  %v929_v0 = vpack.c.bf16 %v169_v59, %v168_v58  ;;  %v170_v6 = vld [vmem:[#allocation7 + $0x2b0] sm:$0xff] }
  0x55   :  { %916 = vmatpush3.bf16.msra.mxu1 %v915_v25  ;;  %886 = vmatprep.subr.bf16.mxu0 %v885_v26  ;;  %v152_v1 = vld [vmem:[#allocation7 + $0x220] sm:$0xff]  ;;  %v153_v2 = vld [vmem:[#allocation7 + $0x228] sm:$0xff]  ;;  %v961_v4 = vpack.c.bf16 %v201_v61, %v200_v60  ;;  %v171_v7 = vld [vmem:[#allocation7 + $0x2b8] sm:$0xff] }
  0x56   :  { %918 = vmatprep.subr.bf16.mxu1 %v917_v30  ;;  %v184_v3 = vld [vmem:[#allocation7 + $0x320] sm:$0xff]  ;;  %v185_v5 = vld [vmem:[#allocation7 + $0x328] sm:$0xff]  ;;  %v154_v8 = vld [vmem:[#allocation7 + $0x230] sm:$0xff]  ;;  %v931_v11 = vpack.c.bf16 %v153_v2, %v152_v1  ;;  %v933_v16 = vpack.c.bf16 %v171_v7, %v170_v6 }
  0x57   :  { %v202_v9 = vld [vmem:[#allocation7 + $0x3b0] sm:$0xff]  ;;  %v203_v10 = vld [vmem:[#allocation7 + $0x3b8] sm:$0xff]  ;;  %v77_v14 = vld [vmem:[#allocation4 + $0x48] sm:$0xff]  ;;  %v963_v15 = vpack.c.bf16 %v185_v5, %v184_v3 }
  0x58   :  { %888 = vmatpush3.bf16.msra.mxu0 %v887_v36  ;;  %v155_v12 = vld [vmem:[#allocation7 + $0x238] sm:$0xff]  ;;  %v186_v13 = vld [vmem:[#allocation7 + $0x330] sm:$0xff]  ;;  %v172_v18 = vld [vmem:[#allocation7 + $0x2c0] sm:$0xff]  ;;  %v965_v20 = vpack.c.bf16 %v203_v10, %v202_v9 }
  0x59   :  { %920 = vmatpush3.bf16.msra.mxu1 %v919_v37  ;;  %922 = vmatprep.subr.bf16.mxu0 %v921_v38  ;;  %v187_v17 = vld [vmem:[#allocation7 + $0x338] sm:$0xff]  ;;  %v173_v21 = vld [vmem:[#allocation7 + $0x2c8] sm:$0xff]  ;;  %v76_v22 = vld [vmem:[#allocation4 + $0x40] sm:$0xff]  ;;  %v935_v26 = vpack.c.bf16 %v155_v12, %v154_v8 }
  0x5a   :  { %954 = vmatprep.subr.bf16.mxu1 %v953_v42  ;;  %v79_v19 = vld [vmem:[#allocation4 + $0x58] sm:$0xff]  ;;  %v78_v23 = vld [vmem:[#allocation4 + $0x50] sm:$0xff]  ;;  %v204_v24 = vld [vmem:[#allocation7 + $0x3c0] sm:$0xff]  ;;  %v967_v29 = vpack.c.bf16 %v187_v17, %v186_v13  ;;  %v937_v30 = vpack.c.bf16 %v173_v21, %v172_v18 }
  0x5b   :  { %277 = vmatmul.mubr.f32.vlgmr.msra.gmra.mrb[0].mxu0 %v68_v48  ;;  %v205_v25 = vld [vmem:[#allocation7 + $0x3c8] sm:$0xff]  ;;  %v156_v27 = vld [vmem:[#allocation7 + $0x240] sm:$0xff]  ;;  %v174_v35 = vld [vmem:[#allocation7 + $0x2d0] sm:$0xff] }
  0x5c   :  { %352 = vmatmul.mubr.f32.vlgmr.msra.gmra.mrb[0].mxu1 %v70_v49  ;;  %924 = vmatpush3.bf16.msra.mxu0 %v923_v50  ;;  %v157_v28 = vld [vmem:[#allocation7 + $0x248] sm:$0xff]  ;;  %v188_v31 = vld [vmem:[#allocation7 + $0x340] sm:$0xff]  ;;  %v969_v34 = vpack.c.bf16 %v205_v25, %v204_v24  ;;  %v175_v36 = vld [vmem:[#allocation7 + $0x2d8] sm:$0xff] }
  0x5d   :  { %956 = vmatpush3.bf16.msra.mxu1 %v955_v51  ;;  %926 = vmatprep.subr.bf16.mxu0 %v925_v52  ;;  %v189_v32 = vld [vmem:[#allocation7 + $0x348] sm:$0xff]  ;;  %v75_v37 = vld [vmem:[#allocation4 + $0x38] sm:$0xff]  ;;  %v206_v38 = vld [vmem:[#allocation7 + $0x3d0] sm:$0xff]  ;;  %v939_v40 = vpack.c.bf16 %v157_v28, %v156_v27  ;;  %v941_v42 = vpack.c.bf16 %v175_v36, %v174_v35 }
  0x5e   :  { %958 = vmatprep.subr.bf16.mxu1 %v957_v56  ;;  %281 = vmatprep.mubr.f32.mxu0 %v77_v14  ;;  %v73_v33 = vld [vmem:[#allocation4 + $0x28] sm:$0xff]  ;;  %v207_v39 = vld [vmem:[#allocation7 + $0x3d8] sm:$0xff]  ;;  %v971_v41 = vpack.c.bf16 %v189_v32, %v188_v31  ;;  %v158_v43 = vld [vmem:[#allocation7 + $0x250] sm:$0xff] }
  0x5f   :  { %356 = vmatprep.mubr.f32.mxu1 %v79_v19  ;;  %282 = vmatmul.mubr.f32.gmra.mrb[2].mxu0 %v76_v22  ;;  %v159_v44 = vld [vmem:[#allocation7 + $0x258] sm:$0xff]  ;;  %v190_v45 = vld [vmem:[#allocation7 + $0x350] sm:$0xff]  ;;  %v973_v46 = vpack.c.bf16 %v207_v39, %v206_v38  ;;  %v176_v48 = vld [vmem:[#allocation7 + $0x2e0] sm:$0xff] }
  0x60   :  { %928 = vmatpush3.bf16.msra.mxu0 %v927_v62  ;;  %357 = vmatmul.mubr.f32.gmra.mrb[2].mxu1 %v78_v23  ;;  %v191_v47 = vld [vmem:[#allocation7 + $0x358] sm:$0xff]  ;;  %v177_v49 = vld [vmem:[#allocation7 + $0x2e8] sm:$0xff]  ;;  %v208_v50 = vld [vmem:[#allocation7 + $0x3e0] sm:$0xff]  ;;  %v943_v52 = vpack.c.bf16 %v159_v44, %v158_v43 }
  0x61   :  { %960 = vmatpush3.bf16.msra.mxu1 %v959_v63  ;;  %930 = vmatprep.subr.bf16.mxu0 %v929_v0  ;;  %v209_v51 = vld [vmem:[#allocation7 + $0x3e8] sm:$0xff]  ;;  %v975_v53 = vpack.c.bf16 %v191_v47, %v190_v45  ;;  %v945_v54 = vpack.c.bf16 %v177_v49, %v176_v48  ;;  %v160_v55 = vld [vmem:[#allocation7 + $0x260] sm:$0xff]  ;;  %v178_v60 = vld [vmem:[#allocation7 + $0x2f0] sm:$0xff] }
  0x62   :  { %962 = vmatprep.subr.bf16.mxu1 %v961_v4  ;;  %426 = vmatprep.mubr.f32.mxu0 %v73_v33  ;;  %v161_v56 = vld [vmem:[#allocation7 + $0x268] sm:$0xff]  ;;  %v192_v57 = vld [vmem:[#allocation7 + $0x360] sm:$0xff]  ;;  %v977_v58 = vpack.c.bf16 %v209_v51, %v208_v50  ;;  %v179_v61 = vld [vmem:[#allocation7 + $0x2f8] sm:$0xff] }
  0x63   :  { %501 = vmatprep.mubr.f32.mxu1 %v75_v37  ;;  %v193_v59 = vld [vmem:[#allocation7 + $0x368] sm:$0xff]  ;;  %v210_v62 = vld [vmem:[#allocation7 + $0x3f0] sm:$0xff]  ;;  %v211_v63 = vld [vmem:[#allocation7 + $0x3f8] sm:$0xff]  ;;  %v947_v0 = vpack.c.bf16 %v161_v56, %v160_v55  ;;  %v949_v2 = vpack.c.bf16 %v179_v61, %v178_v60 }
  0x64   :  { %932 = vmatpush3.bf16.msra.mxu0 %v931_v11  ;;  %v979_v1 = vpack.c.bf16 %v193_v59, %v192_v57  ;;  %v162_v3 = vld [vmem:[#allocation7 + $0x270] sm:$0xff]  ;;  %v163_v4 = vld [vmem:[#allocation7 + $0x278] sm:$0xff]  ;;  %v981_v5 = vpack.c.bf16 %v211_v63, %v210_v62  ;;  %v72_v10 = vld [vmem:[#allocation4 + $0x20] sm:$0xff] }
  0x65   :  { %964 = vmatpush3.bf16.msra.mxu1 %v963_v15  ;;  %934 = vmatprep.subr.bf16.mxu0 %v933_v16  ;;  %v194_v6 = vld [vmem:[#allocation7 + $0x370] sm:$0xff]  ;;  %v195_v7 = vld [vmem:[#allocation7 + $0x378] sm:$0xff]  ;;  %v951_v8 = vpack.c.bf16 %v163_v4, %v162_v3  ;;  %v81_v12 = vld [vmem:[#allocation4 + $0x68] sm:$0xff]  ;;  %v532_v16 = vstv %s1220_s0 }
  0x66   :  { %966 = vmatprep.subr.bf16.mxu1 %v965_v20  ;;  %v983_v9 = vpack.c.bf16 %v195_v7, %v194_v6  ;;  %v74_v11 = vld [vmem:[#allocation4 + $0x30] sm:$0xff]  ;;  %v83_v13 = vld [vmem:[#allocation4 + $0x78] sm:$0xff]  ;;  %v80_v14 = vld [vmem:[#allocation4 + $0x60] sm:$0xff]  ;;  %v533_v20 = vmul.f32 1.442695, %v532_v16 }
  0x67   :  { %v82_v15 = vld [vmem:[#allocation4 + $0x70] sm:$0xff]  ;;  %v541_v17 = vld [vmem:[#allocation9] sm:$0xff]  ;;  %v542_v18 = vld [vmem:[#allocation9 + $0x8] sm:$0xff] }
  0x68   :  { %936 = vmatpush3.bf16.msra.mxu0 %v935_v26  ;;  %v543_v19 = vld [vmem:[#allocation9 + $0x10] sm:$0xff]  ;;  %v985_v21 = vpack.c.bf16 %v542_v18, %v541_v17  ;;  %v544_v22 = vld [vmem:[#allocation9 + $0x18] sm:$0xff]  ;;  %v545_v24 = vld [vmem:[#allocation9 + $0x20] sm:$0xff]  ;;  %1027 = vpow2.f32 %v533_v20 }
  0x69   :  { %968 = vmatpush3.bf16.msra.mxu1 %v967_v29  ;;  %938 = vmatprep.subr.bf16.mxu0 %v937_v30  ;;  %v989_v23 = vpack.c.bf16 %v544_v22, %v543_v19  ;;  %v546_v25 = vld [vmem:[#allocation9 + $0x28] sm:$0xff]  ;;  %v547_v60 = vld [vmem:[#allocation9 + $0x30] sm:$0xff]  ;;  %v548_v61 = vld [vmem:[#allocation9 + $0x38] sm:$0xff] }
  0x6a   :  { %970 = vmatprep.subr.bf16.mxu1 %v969_v34  ;;  %v993_v26 = vpack.c.bf16 %v546_v25, %v545_v24  ;;  %v997_v62 = vpack.c.bf16 %v548_v61, %v547_v60  ;;  %v549_v63 = vld [vmem:[#allocation9 + $0x40] sm:$0xff]  ;;  %v552_v3 = vld [vmem:[#allocation9 + $0x58] sm:$0xff]  ;;  %v554_v6 = vld [vmem:[#allocation9 + $0x68] sm:$0xff] }
  0x6c   :  { %940 = vmatpush3.bf16.msra.mxu0 %v939_v40 }
  0x6d   :  { %972 = vmatpush3.bf16.msra.mxu1 %v971_v41  ;;  %942 = vmatprep.subr.bf16.mxu0 %v941_v42 }
  0x6e   :  { %974 = vmatprep.subr.bf16.mxu1 %v973_v46 }
  0x70   :  { %944 = vmatpush3.bf16.msra.mxu0 %v943_v52 }
  0x71   :  { %976 = vmatpush3.bf16.msra.mxu1 %v975_v53  ;;  %946 = vmatprep.subr.bf16.mxu0 %v945_v54 }
  0x72   :  { %978 = vmatprep.subr.bf16.mxu1 %v977_v58  ;;  %v1028_v27 = vpop.eup %1027 }
  0x73   :  { %1017 = vpush %v1028_v27 }
  0x74   :  { %948 = vmatpush3.bf16.msra.mxu0 %v947_v0  ;;  %v550_v0 = vld [vmem:[#allocation9 + $0x48] sm:$0xff] }
  0x75   :  { %980 = vmatpush3.bf16.msra.mxu1 %v979_v1  ;;  %950 = vmatprep.subr.bf16.mxu0 %v949_v2  ;;  %v1001_v1 = vpack.c.bf16 %v550_v0, %v549_v63  ;;  %v551_v2 = vld [vmem:[#allocation9 + $0x50] sm:$0xff] }
  0x76   :  { %982 = vmatprep.subr.bf16.mxu1 %v981_v5  ;;  %v1005_v4 = vpack.c.bf16 %v552_v3, %v551_v2  ;;  %v553_v5 = vld [vmem:[#allocation9 + $0x60] sm:$0xff] }
  0x77   :  { %v1009_v7 = vpack.c.bf16 %v554_v6, %v553_v5 }
  0x78   :  { %952 = vmatpush3.bf16.msra.mxu0 %v951_v8  ;;  %v555_v8 = vld [vmem:[#allocation9 + $0x70] sm:$0xff] }
  0x79   :  { %984 = vmatpush3.bf16.msra.mxu1 %v983_v9  ;;  %986 = vmatprep.subr.bf16.mxu0 %v985_v21  ;;  %v556_v9 = vld [vmem:[#allocation9 + $0x78] sm:$0xff] }
  0x7b   :  { %427 = vmatmul.mubr.f32.vlgmr.msra.gmra.mrb[4].mxu0 %v72_v10  ;;  %v1013_v10 = vpack.c.bf16 %v556_v9, %v555_v8 }
  0x7c   :  { %502 = vmatmul.mubr.f32.vlgmr.msra.gmra.mrb[4].mxu1 %v74_v11  ;;  %431 = vmatprep.mubr.f32.mxu0 %v81_v12 }
  0x7d   :  { %506 = vmatprep.mubr.f32.mxu1 %v83_v13  ;;  %988 = vmatpush3.bf16.msra.mxu0 %v985_v21 }
  0x7e   :  { %990 = vmatprep.subr.bf16.mxu0 %v989_v23 }
  0x7f   :  { %432 = vmatmul.mubr.f32.gmra.mrb[6].mxu0 %v80_v14 }
  0x80   :  { %507 = vmatmul.mubr.f32.gmra.mrb[6].mxu1 %v82_v15 }
  0x81   :  { %992 = vmatpush3.bf16.msra.mxu0 %v989_v23 }
  0x82   :  { %994 = vmatprep.subr.bf16.mxu0 %v993_v26 }
  0x85   :  { %996 = vmatpush3.bf16.msra.mxu0 %v993_v26 }
  0x86   :  { %998 = vmatprep.subr.bf16.mxu0 %v997_v62 }
  0x89   :  { %1000 = vmatpush3.bf16.msra.mxu0 %v997_v62 }
  0x8a   :  { %1002 = vmatprep.subr.bf16.mxu0 %v1001_v1 }
  0x8d   :  { %1004 = vmatpush3.bf16.msra.mxu0 %v1001_v1 }
  0x8e   :  { %1006 = vmatprep.subr.bf16.mxu0 %v1005_v4 }
  0x91   :  { %1008 = vmatpush3.bf16.msra.mxu0 %v1005_v4 }
  0x92   :  { %1010 = vmatprep.subr.bf16.mxu0 %v1009_v7 }
  0x95   :  { %1012 = vmatpush3.bf16.msra.mxu0 %v1009_v7 }
  0x96   :  { %1014 = vmatprep.subr.bf16.mxu0 %v1013_v10 }
  0x99   :  { %1016 = vmatpush3.bf16.msra.mxu0 %v1013_v10 }
  0xa4   :  { %s1018_s0 = spop %1017 }
  0xa5   :  { %v536_v15 = vstv %s1018_s0 }
 0x12e   :  { %v684_v28 = vpop.f32.mrb[0].mxu0 }
 0x12f   :  { %v722_v29 = vpop.f32.mrb[0].mxu1  ;;  %v685_v30 = vpop.f32.mrb[1].mxu0 }
 0x130   :  { %v686_v31 = vadd.f32 %v685_v30, %v684_v28  ;;  %v723_v32 = vpop.f32.mrb[1].mxu1 }
 0x131   :  { %v724_v33 = vadd.f32 %v723_v32, %v722_v29 }
 0x132   :  { %v687_v35 = vpop.f32.mrb[2].mxu0 }
 0x133   :  { %v354_v34 = vadd.f32 %v724_v33, %v686_v31  ;;  %v725_v36 = vpop.f32.mrb[2].mxu1  ;;  %v688_v37 = vpop.f32.mrb[3].mxu0 }
 0x134   :  { %v689_v38 = vadd.f32 %v688_v37, %v687_v35  ;;  %v726_v39 = vpop.f32.mrb[3].mxu1 }
 0x135   :  { %v727_v40 = vadd.f32 %v726_v39, %v725_v36 }
 0x137   :  { %v359_v41 = vadd.f32 %v727_v40, %v689_v38 }
 0x14e   :  { %v760_v42 = vpop.f32.mrb[4].mxu0 }
 0x14f   :  { %v761_v43 = vpop.f32.mrb[5].mxu0  ;;  %v798_v44 = vpop.f32.mrb[4].mxu1 }
 0x150   :  { %v762_v45 = vadd.f32 %v761_v43, %v760_v42  ;;  %v799_v46 = vpop.f32.mrb[5].mxu1 }
 0x151   :  { %v800_v47 = vadd.f32 %v799_v46, %v798_v44 }
 0x152   :  { %v429_v48 = vadd.f32 %v762_v45, %v354_v34  ;;  %v763_v49 = vpop.f32.mrb[6].mxu0 }
 0x153   :  { %v764_v50 = vpop.f32.mrb[7].mxu0  ;;  %v801_v51 = vpop.f32.mrb[6].mxu1 }
 0x154   :  { %v765_v52 = vadd.f32 %v764_v50, %v763_v49  ;;  %v802_v53 = vpop.f32.mrb[7].mxu1  ;;  %v504_v54 = vadd.f32 %v800_v47, %v429_v48 }
 0x155   :  { %v803_v55 = vadd.f32 %v802_v53, %v801_v51 }
 0x156   :  { %v434_v56 = vadd.f32 %v765_v52, %v359_v41  ;;  %v521_v57 = vmul.f32 %v504_v54, %v504_v54 }
 0x158   :  { %v509_v58 = vadd.f32 %v803_v55, %v434_v56  ;;  %523 = vadd.xlane.f32.xlu0 %v521_v57 }
 0x15a   :  { %v522_v59 = vmul.f32 %v509_v58, %v509_v58 }
 0x15c   :  { %525 = vadd.xlane.f32.xlu0 %v522_v59 }
 0x1e5   :  { %v524_v11 = vpop.xlane.xlu0 %523 }
 0x1e6   :  { %v527_v12 = vmax.f32 %v524_v11, 1e-12 }
 0x1e8   :  { %1029 = vrsqrt.f32 %v527_v12 }
 0x1e9   :  { %v526_v13 = vpop.xlane.xlu0 %525 }
 0x1ea   :  { %v528_v14 = vmax.f32 %v526_v13, 1e-12 }
 0x1ec   :  { %1031 = vrsqrt.f32 %v528_v14 }
 0x1f2   :  { %v1030_v16 = vpop.eup %1029 }
 0x1f3   :  { %v537_v17 = vmul.f32 %v1030_v16, %v536_v15 }
 0x1f5   :  { %v539_v18 = vmul.f32 %v537_v17, %v504_v54 }
 0x1f6   :  { %v1032_v19 = vpop.eup %1031 }
 0x1f7   :  { %v538_v20 = vmul.f32 %v1032_v19, %v536_v15  ;;  %854 = vmatprep.mubr.f32.mxu0 %v539_v18 }
 0x1f9   :  { %v540_v21 = vmul.f32 %v538_v20, %v509_v58 }
 0x1fb   :  { %855 = vmatmul.mubr.f32.vlgmr.msra.gmra.mrb[8].mxu0 %v540_v21 }
 0x2ce   :  { %v856_v22 = vpop.f32.mrb[8].mxu0 }
 0x2cf   :  { %633 = vst [vmem:[#allocation10 + $0x8] sm:$0xff] %v856_v22  ;;  %v623_v23 = vpop.f32.mrb[9].mxu0 }
 0x2d0   :  { %632 = vst [vmem:[#allocation10] sm:$0xff] %v623_v23 }
 0x2d1   :  { %1110 = shalt.err (!%p1107_p0)
}
 0x2d2   :  { %s1111_s9 = scalar_lea.hbm %s1224_s4, 256 }
 0x2d3   :  { %p1112_p1 = scmp.ne.s32.totalorder %s1224_s4, %s1111_s9  ;;  %p1115_p2 = scmp.lt.u32.totalorder %s1111_s9, %s1224_s4 }
 0x2d5   :  { %p1117_p3 = pnand %p1115_p2, %p1112_p1 }
 0x2d7   :  { %1120 = shalt.err (!%p1117_p3)
}
 0x2d8   :  { %645 = dma.vmem_to_hbm [thread:$0]  %s640_s5, 256, %s1224_s4, [#allocation6], %s1128_s25, %s1128_s25, %s1129_s26  }
 0x2d9   :  { %1125 = dma.done.wait [#allocation6], 256  }
 0x2da   :  { %1126 = vsyncadd [#allocation6], 4294967040 }
 0x2db   :  { %649 = vsyncpa [#allocation5], 1 }
 0x2dc   :  { %650 = vsyncpa [#allocation8], 1 }
 0x2dd   :  { %651 = vsyncpa [#allocation6], 1 }

</bundles_post_ra>
